<compile_context>
chip_gen: v7x
topology: tpu7x:2x2x1
jax: 0.10.0
libtpu: 0.0.40
codegen_flags: <defaults>
</compile_context>

<pallas_src>
import numpy as np
import jax
import jax.numpy as jnp
from jax import lax
from jax.experimental import pallas as pl
from jax.experimental.pallas import tpu as pltpu

MEL_BINS  = 90   # matches the module's hard-coded self.mel_bins = 90
HIDDEN    = 32
NUM_CLS   = 4
TIMESTEPS = 4    # get_noise_schedule_list(timesteps=4)


# --------------------------------------------------------------------------
# noise schedule (plain numpy glue; identical math to the PyTorch __init__)
# --------------------------------------------------------------------------
def make_schedule(timesteps=TIMESTEPS, min_beta=1e-4, max_beta=0.02):
    betas = np.linspace(min_beta, max_beta, timesteps)
    alphas = 1.0 - betas
    ac = np.cumprod(alphas)
    ac_prev = np.append(1.0, ac[:-1])
    post_var = betas * (1.0 - ac_prev) / (1.0 - ac)
    sched = dict(
        sqrt_alphas_cumprod=np.sqrt(ac),
        sqrt_one_minus_alphas_cumprod=np.sqrt(1.0 - ac),
        posterior_variance=post_var,
        posterior_log_variance_clipped=np.log(np.maximum(post_var, 1e-20)),
        posterior_mean_coef1=betas * np.sqrt(ac_prev) / (1.0 - ac),
        posterior_mean_coef2=(1.0 - ac_prev) * np.sqrt(alphas) / (1.0 - ac),
    )
    return {k: jnp.asarray(v, jnp.float32) for k, v in sched.items()}


def _round_up(x, m):
    return (x + m - 1) // m * m


# --------------------------------------------------------------------------
# Fused kernel: diffuse(t), diffuse(t-1), synthetic denoiser (+clamp),
#               q_posterior_sample — one grid step per batch element.
#
# scal layout per batch b (mel_mask already folded in on the host):
#   [0] a_t    : coeff on mel   for x_t
#   [1] b_t    : coeff on noise for x_t
#   [2] a_prev : coeff on mel   for x_t_prev
#   [3] b_prev : coeff on noise for x_t_prev
#   [4] c1     : posterior_mean_coef1 * mask
#   [5] c2     : posterior_mean_coef2 * mask
#   [6] sigma  : mask * nonzero * exp(0.5 * posterior_log_variance)
#   [7] unused (pad)
# --------------------------------------------------------------------------
def _fused_diffusion_kernel(scal_ref, mel_ref, cond_ref, nt_ref, nprev_ref, ns_ref,
                            wcat_ref, bias_ref, wcls_ref,
                            x0_ref, xt_ref, xtp_ref, xtpp_ref, a_ref, cls_ref):
    b = pl.program_id(0)
    mp = mel_ref.shape[-1]            # lane-padded mel bins (multiple of 128)
    h = cond_ref.shape[-1]

    mel = mel_ref[0]                  # (T, MP)

    # ---- diffuse_fn(mel, t) and diffuse_fn(mel, t-1); mel_mask & t<0 passthrough
    #      are folded into the coefficients host-side.
    x_t = scal_ref[b, 0] * mel + scal_ref[b, 1] * nt_ref[0]
    xt_ref[0] = x_t
    xtp_ref[0] = scal_ref[b, 2] * mel + scal_ref[b, 3] * nprev_ref[0]

    # ---- synthetic denoiser (stand-in for the undefined Denoiser submodule) ----
    c = cond_ref[0]                   # (T, H)
    wm = wcat_ref[:mp, :]             # (MP, MP)  sublane-aligned static slice
    wc = wcat_ref[mp:mp + h, :]       # (H,  MP)
    hid = (jnp.dot(x_t, wm, preferred_element_type=jnp.float32)
           + jnp.dot(c, wc, preferred_element_type=jnp.float32)
           + bias_ref[...])
    # clip_denoised=True clamp fused into the epilogue.
    x0 = jnp.clip(jnp.tanh(hid), -1.0, 1.0)
    x0_ref[0] = x0

    # attention-like map A = softmax(c c^T / sqrt(H)); contraction on the last
    # dims (no materialized transpose).  approx reciprocal rides the EUP slot.
    scores = lax.dot_general(c, c, (((1,), (1,)), ((), ())),
                             preferred_element_type=jnp.float32)
    scores = scores * (1.0 / jnp.sqrt(jnp.float32(h)))
    scores = scores - jnp.max(scores, axis=-1, keepdims=True)
    e = jnp.exp(scores)
    a_ref[0] = e * pl.reciprocal(jnp.sum(e, axis=-1, keepdims=True), approx=True)

    # classifier head on time-pooled cond
    cmean = jnp.mean(c, axis=0, keepdims=True)            # (1, H)
    cls_ref[0] = jnp.dot(cmean, wcls_ref[...], preferred_element_type=jnp.float32)

    # ---- q_posterior_sample with the clamped x_0_pred as x_start (model != 'shallow')
    xtpp_ref[0] = (scal_ref[b, 4] * x0
                   + scal_ref[b, 5] * x_t
                   + scal_ref[b, 6] * ns_ref[0])


# --------------------------------------------------------------------------
# full forward (model != 'shallow' branch; mel_mask is a scalar, as in defaults)
# --------------------------------------------------------------------------
def gaussian_diffusion_forward(mel, cond, t, noise_t, noise_p, noise_s,
                               wm, wc, bias, wcls, sched, mel_mask=1.0):
    B, T, M = mel.shape
    H = cond.shape[-1]
    MP = _round_up(M, 128)            # lane-dense mel-bin dimension (90 -> 128)
    pad = MP - M

    # --- layout plumbing: pad mel / noises / weights to 128 lanes (zeros) ---
    pad3 = lambda a: jnp.pad(a, ((0, 0), (0, 0), (0, pad)))
    mel_p = pad3(mel)
    nt_p = pad3(noise_t)
    nprev_p = pad3(noise_p)
    ns_p = pad3(noise_s)
    wcat = jnp.concatenate([jnp.pad(wm, ((0, pad), (0, pad))),
                            jnp.pad(wc, ((0, 0), (0, pad)))], axis=0)   # (MP+H, MP)
    bias_p = jnp.pad(bias, ((0, 0), (0, pad)))

    # --- per-batch fused coefficients (mel_mask folded in, no in-kernel exp) ---
    mm = jnp.float32(mel_mask)

    def diffuse_coeffs(tt):
        passthrough = (tt < 0).astype(jnp.float32)        # diffuse_fn: out[t<0] = x_start
        tc = jnp.maximum(tt, 0)
        sac = sched["sqrt_alphas_cumprod"][tc]
        som = sched["sqrt_one_minus_alphas_cumprod"][tc]
        a = mm * (passthrough + (1.0 - passthrough) * sac)
        bn = mm * (1.0 - passthrough) * som
        return a, bn

    a_t, b_t = diffuse_coeffs(t)
    a_prev, b_prev = diffuse_coeffs(t - 1)
    c1 = mm * sched["posterior_mean_coef1"][t]
    c2 = mm * sched["posterior_mean_coef2"][t]
    nz = 1.0 - (t == 0).astype(jnp.float32)               # nonzero_mask
    sigma = mm * nz * jnp.exp(0.5 * sched["posterior_log_variance_clipped"][t])
    scal = jnp.stack([a_t, b_t, a_prev, b_prev, c1, c2, sigma,
                      jnp.zeros_like(a_t)], axis=-1).astype(jnp.float32)  # (B, 8)

    blk = lambda last: pl.BlockSpec((1, T, last), lambda b: (b, 0, 0))
    full = lambda shape: pl.BlockSpec(shape, lambda b: (0,) * len(shape))
    smem = pl.BlockSpec(memory_space=pltpu.MemorySpace.SMEM)

    x0_p, xt_p, xtp_p, xtpp_p, A, cls3 = pl.pallas_call(
        _fused_diffusion_kernel,
        out_shape=(jax.ShapeDtypeStruct((B, T, MP), jnp.float32),   # x_0_pred
                   jax.ShapeDtypeStruct((B, T, MP), jnp.float32),   # x_t
                   jax.ShapeDtypeStruct((B, T, MP), jnp.float32),   # x_t_prev
                   jax.ShapeDtypeStruct((B, T, MP), jnp.float32),   # x_t_prev_pred
                   jax.ShapeDtypeStruct((B, T, T), jnp.float32),    # A
                   jax.ShapeDtypeStruct((B, 1, NUM_CLS), jnp.float32)),
        grid=(B,),
        in_specs=[smem,                       # packed per-batch scalars
                  blk(MP),                    # mel (padded)
                  blk(H),                     # cond
                  blk(MP), blk(MP), blk(MP),  # noise_t, noise_{t-1}, noise_sample
                  full((MP + H, MP)),         # stacked denoiser weight [wm; wc]
                  full((1, MP)),              # bias
                  full((H, NUM_CLS))],        # classifier weight
        out_specs=(blk(MP), blk(MP), blk(MP), blk(MP),
                   blk(T),
                   pl.BlockSpec((1, 1, NUM_CLS), lambda b: (b, 0, 0))),
        compiler_params=pltpu.CompilerParams(
            dimension_semantics=("parallel",)),   # one batch per core on v7x
    )(scal, mel_p, cond, nt_p, nprev_p, ns_p, wcat, bias_p, wcls)

    # slice the lane padding back off (outputs already in final (B, T, M) layout,
    # i.e. the PyTorch [:, 0].transpose(1, 2))
    sl = lambda a: a[..., :M]
    return sl(x0_p), sl(xt_p), sl(xtp_p), sl(xtpp_p), t, A, cls3[:, 0, :]


if __name__ == "__main__":
    B, T, M, H = 2, 16, MEL_BINS, HIDDEN
    key = jax.random.PRNGKey(0)
    (k_mel, k_cond, k_t, k_n1, k_n2, k_n3,
     k_wm, k_wc, k_wcls) = jax.random.split(key, 9)

    mel = jax.random.normal(k_mel, (B, T, M), jnp.float32)      # (B, T, mel_bins)
    cond = jax.random.normal(k_cond, (B, T, H), jnp.float32)    # (B, T, hidden)
    t = jax.random.randint(k_t, (B,), 0, TIMESTEPS, jnp.int32)  # torch.randint(0, num_timesteps)
    noise_t = jax.random.normal(k_n1, (B, T, M), jnp.float32)   # randn_like in diffuse_fn(t)
    noise_p = jax.random.normal(k_n2, (B, T, M), jnp.float32)   # randn_like in diffuse_fn(t-1)
    noise_s = jax.random.normal(k_n3, (B, T, M), jnp.float32)   # noise_like in q_posterior_sample

    # deterministic synthetic denoiser parameters
    wm = jax.random.normal(k_wm, (M, M), jnp.float32) * 0.1
    wc = jax.random.normal(k_wc, (H, M), jnp.float32) * 0.1
    bias = jnp.zeros((1, M), jnp.float32)
    wcls = jax.random.normal(k_wcls, (H, NUM_CLS), jnp.float32) * 0.1

    sched = make_schedule()
    outs = gaussian_diffusion_forward(mel, cond, t, noise_t, noise_p, noise_s,
                                      wm, wc, bias, wcls, sched)
    outs = jax.tree_util.tree_map(jax.block_until_ready, outs)

    x_0_pred, x_t, x_t_prev, x_t_prev_pred, t_out, A, cls_pred = outs
    assert x_0_pred.shape == (B, T, M) and x_t.shape == (B, T, M)
    assert x_t_prev.shape == (B, T, M) and x_t_prev_pred.shape == (B, T, M)
    assert A.shape == (B, T, T) and cls_pred.shape == (B, NUM_CLS)
    assert t_out.shape == (B,)
    assert bool(jnp.all(jnp.isfinite(x_t_prev_pred)))
    assert bool(jnp.all(jnp.abs(x_0_pred) <= 1.0))
    print("KERNEL_OK")
</pallas_src>

<mosaic_0001>
module attributes {stable_mosaic.version = 11 : i64} {
  func.func @_fused_diffusion_kernel(%arg0: i32, %arg1: memref<2x8xf32, #tpu.memory_space<smem>>, %arg2: memref<1x16x128xf32, #tpu.memory_space<vmem>>, %arg3: memref<1x16x32xf32, #tpu.memory_space<vmem>>, %arg4: memref<1x16x128xf32, #tpu.memory_space<vmem>>, %arg5: memref<1x16x128xf32, #tpu.memory_space<vmem>>, %arg6: memref<1x16x128xf32, #tpu.memory_space<vmem>>, %arg7: memref<160x128xf32, #tpu.memory_space<vmem>>, %arg8: memref<1x128xf32, #tpu.memory_space<vmem>>, %arg9: memref<32x4xf32, #tpu.memory_space<vmem>>, %arg10: memref<1x16x128xf32, #tpu.memory_space<vmem>>, %arg11: memref<1x16x128xf32, #tpu.memory_space<vmem>>, %arg12: memref<1x16x128xf32, #tpu.memory_space<vmem>>, %arg13: memref<1x16x128xf32, #tpu.memory_space<vmem>>, %arg14: memref<1x16x16xf32, #tpu.memory_space<vmem>>, %arg15: memref<1x1x4xf32, #tpu.memory_space<vmem>>) attributes {dimension_semantics = [#tpu.dimension_semantics<parallel>], iteration_bounds = array<i64: 2>, scalar_prefetch = 0 : i64, scratch_operands = 0 : i64, tpu.core_type = #tpu.core_type<tc>, window_params = [{transform_indices = @transform_0, window_bounds = array<i64: 2, 8>}, {transform_indices = @transform_1, window_bounds = array<i64: 1, 16, 128>}, {transform_indices = @transform_2, window_bounds = array<i64: 1, 16, 32>}, {transform_indices = @transform_3, window_bounds = array<i64: 1, 16, 128>}, {transform_indices = @transform_4, window_bounds = array<i64: 1, 16, 128>}, {transform_indices = @transform_5, window_bounds = array<i64: 1, 16, 128>}, {pipeline_mode = #tpu.pipeline_mode<synchronous>, transform_indices = @transform_6, window_bounds = array<i64: 160, 128>}, {pipeline_mode = #tpu.pipeline_mode<synchronous>, transform_indices = @transform_7, window_bounds = array<i64: 1, 128>}, {pipeline_mode = #tpu.pipeline_mode<synchronous>, transform_indices = @transform_8, window_bounds = array<i64: 32, 4>}, {transform_indices = @transform_9, window_bounds = array<i64: 1, 16, 128>}, {transform_indices = @transform_10, window_bounds = array<i64: 1, 16, 128>}, {transform_indices = @transform_11, window_bounds = array<i64: 1, 16, 128>}, {transform_indices = @transform_12, window_bounds = array<i64: 1, 16, 128>}, {transform_indices = @transform_13, window_bounds = array<i64: 1, 16, 16>}, {transform_indices = @transform_14, window_bounds = array<i64: 1, 1, 4>}]} {
    %c0 = arith.constant 0 : index
    %c0_0 = arith.constant 0 : index
    %c0_1 = arith.constant 0 : index
    %0 = vector.load %arg2[%c0, %c0_0, %c0_1] : memref<1x16x128xf32, #tpu.memory_space<vmem>>, vector<1x16x128xf32>
    %1 = vector.shape_cast %0 : vector<1x16x128xf32> to vector<16x128xf32>
    %2 = arith.index_cast %arg0 : i32 to index
    %c0_2 = arith.constant 0 : index
    %3 = memref.load %arg1[%2, %c0_2] : memref<2x8xf32, #tpu.memory_space<smem>>
    %4 = vector.broadcast %3 : f32 to vector<16x128xf32>
    %5 = arith.mulf %4, %1 : vector<16x128xf32>
    %6 = arith.index_cast %arg0 : i32 to index
    %c1 = arith.constant 1 : index
    %7 = memref.load %arg1[%6, %c1] : memref<2x8xf32, #tpu.memory_space<smem>>
    %c0_3 = arith.constant 0 : index
    %c0_4 = arith.constant 0 : index
    %c0_5 = arith.constant 0 : index
    %8 = vector.load %arg4[%c0_3, %c0_4, %c0_5] : memref<1x16x128xf32, #tpu.memory_space<vmem>>, vector<1x16x128xf32>
    %9 = vector.shape_cast %8 : vector<1x16x128xf32> to vector<16x128xf32>
    %10 = vector.broadcast %7 : f32 to vector<16x128xf32>
    %11 = arith.mulf %10, %9 : vector<16x128xf32>
    %12 = arith.addf %5, %11 : vector<16x128xf32>
    %c0_6 = arith.constant 0 : index
    %c0_7 = arith.constant 0 : index
    %c0_8 = arith.constant 0 : index
    %13 = vector.load %arg11[%c0_6, %c0_7, %c0_8] : memref<1x16x128xf32, #tpu.memory_space<vmem>>, vector<1x16x128xf32>
    %14 = vector.shape_cast %13 : vector<1x16x128xf32> to vector<16x128xf32>
    %15 = vector.shape_cast %12 : vector<16x128xf32> to vector<1x16x128xf32>
    tpu.vector_store %arg11[%c0_6, %c0_7, %c0_8], %15 {strides = array<i32>} : memref<1x16x128xf32, #tpu.memory_space<vmem>>, vector<1x16x128xf32>,
    %16 = arith.index_cast %arg0 : i32 to index
    %c2 = arith.constant 2 : index
    %17 = memref.load %arg1[%16, %c2] : memref<2x8xf32, #tpu.memory_space<smem>>
    %18 = vector.broadcast %17 : f32 to vector<16x128xf32>
    %19 = arith.mulf %18, %1 : vector<16x128xf32>
    %20 = arith.index_cast %arg0 : i32 to index
    %c3 = arith.constant 3 : index
    %21 = memref.load %arg1[%20, %c3] : memref<2x8xf32, #tpu.memory_space<smem>>
    %c0_9 = arith.constant 0 : index
    %c0_10 = arith.constant 0 : index
    %c0_11 = arith.constant 0 : index
    %22 = vector.load %arg5[%c0_9, %c0_10, %c0_11] : memref<1x16x128xf32, #tpu.memory_space<vmem>>, vector<1x16x128xf32>
    %23 = vector.shape_cast %22 : vector<1x16x128xf32> to vector<16x128xf32>
    %24 = vector.broadcast %21 : f32 to vector<16x128xf32>
    %25 = arith.mulf %24, %23 : vector<16x128xf32>
    %26 = arith.addf %19, %25 : vector<16x128xf32>
    %c0_12 = arith.constant 0 : index
    %c0_13 = arith.constant 0 : index
    %c0_14 = arith.constant 0 : index
    %27 = vector.load %arg12[%c0_12, %c0_13, %c0_14] : memref<1x16x128xf32, #tpu.memory_space<vmem>>, vector<1x16x128xf32>
    %28 = vector.shape_cast %27 : vector<1x16x128xf32> to vector<16x128xf32>
    %29 = vector.shape_cast %26 : vector<16x128xf32> to vector<1x16x128xf32>
    tpu.vector_store %arg12[%c0_12, %c0_13, %c0_14], %29 {strides = array<i32>} : memref<1x16x128xf32, #tpu.memory_space<vmem>>, vector<1x16x128xf32>,
    %c0_15 = arith.constant 0 : index
    %c0_16 = arith.constant 0 : index
    %c0_17 = arith.constant 0 : index
    %30 = vector.load %arg3[%c0_15, %c0_16, %c0_17] : memref<1x16x32xf32, #tpu.memory_space<vmem>>, vector<1x16x32xf32>
    %31 = vector.shape_cast %30 : vector<1x16x32xf32> to vector<16x32xf32>
    %c0_18 = arith.constant 0 : index
    %c0_19 = arith.constant 0 : index
    %32 = vector.load %arg7[%c0_18, %c0_19] : memref<160x128xf32, #tpu.memory_space<vmem>>, vector<128x128xf32>
    %c128 = arith.constant 128 : index
    %c0_20 = arith.constant 0 : index
    %33 = vector.load %arg7[%c128, %c0_20] : memref<160x128xf32, #tpu.memory_space<vmem>>, vector<32x128xf32>
    %cst = arith.constant dense<0.000000e+00> : vector<16x128xf32>
    %34 = tpu.matmul %12, %32, %cst {dimension_numbers = #tpu.dot_dimension_numbers<[1], [0], [0], [1], [0, 0, 1, 1], [], []>} : vector<16x128xf32>, vector<128x128xf32>, vector<16x128xf32> -> vector<16x128xf32>
    %cst_21 = arith.constant dense<0.000000e+00> : vector<16x128xf32>
    %35 = tpu.matmul %31, %33, %cst_21 {dimension_numbers = #tpu.dot_dimension_numbers<[1], [0], [0], [1], [0, 0, 1, 1], [], []>} : vector<16x32xf32>, vector<32x128xf32>, vector<16x128xf32> -> vector<16x128xf32>
    %36 = arith.addf %34, %35 : vector<16x128xf32>
    %c0_22 = arith.constant 0 : index
    %c0_23 = arith.constant 0 : index
    %37 = vector.load %arg8[%c0_22, %c0_23] : memref<1x128xf32, #tpu.memory_space<vmem>>, vector<1x128xf32>
    %38 = vector.broadcast %37 : vector<1x128xf32> to vector<16x128xf32>
    %39 = arith.addf %36, %38 : vector<16x128xf32>
    %40 = math.tanh %39 : vector<16x128xf32>
    %cst_24 = arith.constant -1.000000e+00 : f32
    %cst_25 = arith.constant 1.000000e+00 : f32
    %41 = vector.broadcast %cst_24 : f32 to vector<16x128xf32>
    %42 = arith.maximumf %41, %40 : vector<16x128xf32>
    %43 = vector.broadcast %cst_25 : f32 to vector<16x128xf32>
    %44 = arith.minimumf %43, %42 : vector<16x128xf32>
    %c0_26 = arith.constant 0 : index
    %c0_27 = arith.constant 0 : index
    %c0_28 = arith.constant 0 : index
    %45 = vector.load %arg10[%c0_26, %c0_27, %c0_28] : memref<1x16x128xf32, #tpu.memory_space<vmem>>, vector<1x16x128xf32>
    %46 = vector.shape_cast %45 : vector<1x16x128xf32> to vector<16x128xf32>
    %47 = vector.shape_cast %44 : vector<16x128xf32> to vector<1x16x128xf32>
    tpu.vector_store %arg10[%c0_26, %c0_27, %c0_28], %47 {strides = array<i32>} : memref<1x16x128xf32, #tpu.memory_space<vmem>>, vector<1x16x128xf32>,
    %cst_29 = arith.constant dense<0.000000e+00> : vector<16x16xf32>
    %48 = tpu.matmul %31, %31, %cst_29 {dimension_numbers = #tpu.dot_dimension_numbers<[1], [1], [0], [0], [0, 0, 1, 0], [], []>} : vector<16x32xf32>, vector<16x32xf32>, vector<16x16xf32> -> vector<16x16xf32>
    %cst_30 = arith.constant 3.200000e+01 : f32
    %49 = math.sqrt %cst_30 : f32
    %cst_31 = arith.constant 1.000000e+00 : f32
    %50 = arith.divf %cst_31, %49 : f32
    %51 = vector.broadcast %50 : f32 to vector<16x16xf32>
    %52 = arith.mulf %48, %51 : vector<16x16xf32>
    %cst_32 = arith.constant dense<0xFF800000> : vector<16xf32>
    %53 = vector.multi_reduction <maximumf>, %52, %cst_32 [1] : vector<16x16xf32> to vector<16xf32>
    %54 = vector.shape_cast %53 : vector<16xf32> to vector<16x1xf32>
    %55 = vector.broadcast %54 : vector<16x1xf32> to vector<16x16xf32>
    %56 = arith.subf %52, %55 : vector<16x16xf32>
    %57 = math.exp %56 : vector<16x16xf32>
    %cst_33 = arith.constant dense<0.000000e+00> : vector<16xf32>
    %58 = vector.multi_reduction <add>, %57, %cst_33 [1] : vector<16x16xf32> to vector<16xf32>
    %59 = vector.shape_cast %58 : vector<16xf32> to vector<16x1xf32>
    %60 = tpu.reciprocal %59 {approx = true} : vector<16x1xf32> -> vector<16x1xf32>
    %61 = vector.broadcast %60 : vector<16x1xf32> to vector<16x16xf32>
    %62 = arith.mulf %57, %61 : vector<16x16xf32>
    %c0_34 = arith.constant 0 : index
    %c0_35 = arith.constant 0 : index
    %c0_36 = arith.constant 0 : index
    %63 = vector.load %arg14[%c0_34, %c0_35, %c0_36] : memref<1x16x16xf32, #tpu.memory_space<vmem>>, vector<1x16x16xf32>
    %64 = vector.shape_cast %63 : vector<1x16x16xf32> to vector<16x16xf32>
    %65 = vector.shape_cast %62 : vector<16x16xf32> to vector<1x16x16xf32>
    tpu.vector_store %arg14[%c0_34, %c0_35, %c0_36], %65 {strides = array<i32>} : memref<1x16x16xf32, #tpu.memory_space<vmem>>, vector<1x16x16xf32>,
    %cst_37 = arith.constant dense<0.000000e+00> : vector<32xf32>
    %66 = vector.multi_reduction <add>, %31, %cst_37 [0] : vector<16x32xf32> to vector<32xf32>
    %67 = vector.shape_cast %66 : vector<32xf32> to vector<1x32xf32>
    %cst_38 = arith.constant 1.600000e+01 : f32
    %68 = vector.broadcast %cst_38 : f32 to vector<1x32xf32>
    %69 = arith.divf %67, %68 : vector<1x32xf32>
    %c0_39 = arith.constant 0 : index
    %c0_40 = arith.constant 0 : index
    %70 = vector.load %arg9[%c0_39, %c0_40] : memref<32x4xf32, #tpu.memory_space<vmem>>, vector<32x4xf32>
    %cst_41 = arith.constant dense<0.000000e+00> : vector<1x4xf32>
    %71 = tpu.matmul %69, %70, %cst_41 {dimension_numbers = #tpu.dot_dimension_numbers<[1], [0], [0], [1], [0, 0, 1, 1], [], []>} : vector<1x32xf32>, vector<32x4xf32>, vector<1x4xf32> -> vector<1x4xf32>
    %c0_42 = arith.constant 0 : index
    %c0_43 = arith.constant 0 : index
    %c0_44 = arith.constant 0 : index
    %72 = vector.load %arg15[%c0_42, %c0_43, %c0_44] : memref<1x1x4xf32, #tpu.memory_space<vmem>>, vector<1x1x4xf32>
    %73 = vector.shape_cast %72 : vector<1x1x4xf32> to vector<1x4xf32>
    %74 = vector.shape_cast %71 : vector<1x4xf32> to vector<1x1x4xf32>
    tpu.vector_store %arg15[%c0_42, %c0_43, %c0_44], %74 {strides = array<i32>} : memref<1x1x4xf32, #tpu.memory_space<vmem>>, vector<1x1x4xf32>,
    %75 = arith.index_cast %arg0 : i32 to index
    %c4 = arith.constant 4 : index
    %76 = memref.load %arg1[%75, %c4] : memref<2x8xf32, #tpu.memory_space<smem>>
    %77 = vector.broadcast %76 : f32 to vector<16x128xf32>
    %78 = arith.mulf %77, %44 : vector<16x128xf32>
    %79 = arith.index_cast %arg0 : i32 to index
    %c5 = arith.constant 5 : index
    %80 = memref.load %arg1[%79, %c5] : memref<2x8xf32, #tpu.memory_space<smem>>
    %81 = vector.broadcast %80 : f32 to vector<16x128xf32>
    %82 = arith.mulf %81, %12 : vector<16x128xf32>
    %83 = arith.addf %78, %82 : vector<16x128xf32>
    %84 = arith.index_cast %arg0 : i32 to index
    %c6 = arith.constant 6 : index
    %85 = memref.load %arg1[%84, %c6] : memref<2x8xf32, #tpu.memory_space<smem>>
    %c0_45 = arith.constant 0 : index
    %c0_46 = arith.constant 0 : index
    %c0_47 = arith.constant 0 : index
    %86 = vector.load %arg6[%c0_45, %c0_46, %c0_47] : memref<1x16x128xf32, #tpu.memory_space<vmem>>, vector<1x16x128xf32>
    %87 = vector.shape_cast %86 : vector<1x16x128xf32> to vector<16x128xf32>
    %88 = vector.broadcast %85 : f32 to vector<16x128xf32>
    %89 = arith.mulf %88, %87 : vector<16x128xf32>
    %90 = arith.addf %83, %89 : vector<16x128xf32>
    %c0_48 = arith.constant 0 : index
    %c0_49 = arith.constant 0 : index
    %c0_50 = arith.constant 0 : index
    %91 = vector.load %arg13[%c0_48, %c0_49, %c0_50] : memref<1x16x128xf32, #tpu.memory_space<vmem>>, vector<1x16x128xf32>
    %92 = vector.shape_cast %91 : vector<1x16x128xf32> to vector<16x128xf32>
    %93 = vector.shape_cast %90 : vector<16x128xf32> to vector<1x16x128xf32>
    tpu.vector_store %arg13[%c0_48, %c0_49, %c0_50], %93 {strides = array<i32>} : memref<1x16x128xf32, #tpu.memory_space<vmem>>, vector<1x16x128xf32>,
    return
  }
  func.func @transform_0(%arg0: i32) -> (i32, i32) {
    %c0_i32 = arith.constant 0 : i32
    %c0_i32_0 = arith.constant 0 : i32
    %c0_i32_1 = arith.constant 0 : i32
    return %c0_i32, %c0_i32_0 : i32, i32
  }
  func.func @transform_1(%arg0: i32) -> (i32, i32, i32) {
    %c0_i32 = arith.constant 0 : i32
    %c0_i32_0 = arith.constant 0 : i32
    %c0_i32_1 = arith.constant 0 : i32
    return %arg0, %c0_i32, %c0_i32_0 : i32, i32, i32
  }
  func.func @transform_2(%arg0: i32) -> (i32, i32, i32) {
    %c0_i32 = arith.constant 0 : i32
    %c0_i32_0 = arith.constant 0 : i32
    %c0_i32_1 = arith.constant 0 : i32
    return %arg0, %c0_i32, %c0_i32_0 : i32, i32, i32
  }
  func.func @transform_3(%arg0: i32) -> (i32, i32, i32) {
    %c0_i32 = arith.constant 0 : i32
    %c0_i32_0 = arith.constant 0 : i32
    %c0_i32_1 = arith.constant 0 : i32
    return %arg0, %c0_i32, %c0_i32_0 : i32, i32, i32
  }
  func.func @transform_4(%arg0: i32) -> (i32, i32, i32) {
    %c0_i32 = arith.constant 0 : i32
    %c0_i32_0 = arith.constant 0 : i32
    %c0_i32_1 = arith.constant 0 : i32
    return %arg0, %c0_i32, %c0_i32_0 : i32, i32, i32
  }
  func.func @transform_5(%arg0: i32) -> (i32, i32, i32) {
    %c0_i32 = arith.constant 0 : i32
    %c0_i32_0 = arith.constant 0 : i32
    %c0_i32_1 = arith.constant 0 : i32
    return %arg0, %c0_i32, %c0_i32_0 : i32, i32, i32
  }
  func.func @transform_6(%arg0: i32) -> (i32, i32) {
    %c0_i32 = arith.constant 0 : i32
    %c0_i32_0 = arith.constant 0 : i32
    %c0_i32_1 = arith.constant 0 : i32
    return %c0_i32, %c0_i32_0 : i32, i32
  }
  func.func @transform_7(%arg0: i32) -> (i32, i32) {
    %c0_i32 = arith.constant 0 : i32
    %c0_i32_0 = arith.constant 0 : i32
    %c0_i32_1 = arith.constant 0 : i32
    return %c0_i32, %c0_i32_0 : i32, i32
  }
  func.func @transform_8(%arg0: i32) -> (i32, i32) {
    %c0_i32 = arith.constant 0 : i32
    %c0_i32_0 = arith.constant 0 : i32
    %c0_i32_1 = arith.constant 0 : i32
    return %c0_i32, %c0_i32_0 : i32, i32
  }
  func.func @transform_9(%arg0: i32) -> (i32, i32, i32) {
    %c0_i32 = arith.constant 0 : i32
    %c0_i32_0 = arith.constant 0 : i32
    %c0_i32_1 = arith.constant 0 : i32
    return %arg0, %c0_i32, %c0_i32_0 : i32, i32, i32
  }
  func.func @transform_10(%arg0: i32) -> (i32, i32, i32) {
    %c0_i32 = arith.constant 0 : i32
    %c0_i32_0 = arith.constant 0 : i32
    %c0_i32_1 = arith.constant 0 : i32
    return %arg0, %c0_i32, %c0_i32_0 : i32, i32, i32
  }
  func.func @transform_11(%arg0: i32) -> (i32, i32, i32) {
    %c0_i32 = arith.constant 0 : i32
    %c0_i32_0 = arith.constant 0 : i32
    %c0_i32_1 = arith.constant 0 : i32
    return %arg0, %c0_i32, %c0_i32_0 : i32, i32, i32
  }
  func.func @transform_12(%arg0: i32) -> (i32, i32, i32) {
    %c0_i32 = arith.constant 0 : i32
    %c0_i32_0 = arith.constant 0 : i32
    %c0_i32_1 = arith.constant 0 : i32
    return %arg0, %c0_i32, %c0_i32_0 : i32, i32, i32
  }
  func.func @transform_13(%arg0: i32) -> (i32, i32, i32) {
    %c0_i32 = arith.constant 0 : i32
    %c0_i32_0 = arith.constant 0 : i32
    %c0_i32_1 = arith.constant 0 : i32
    return %arg0, %c0_i32, %c0_i32_0 : i32, i32, i32
  }
  func.func @transform_14(%arg0: i32) -> (i32, i32, i32) {
    %c0_i32 = arith.constant 0 : i32
    %c0_i32_0 = arith.constant 0 : i32
    %c0_i32_1 = arith.constant 0 : i32
    return %arg0, %c0_i32, %c0_i32_0 : i32, i32, i32
  }
}

</mosaic_0001>

<bundles_post_ra>
// kernel: tpu_custom_call.1
= control target key start
LH: loop header
LB: loop body
LE: loop exit
PB: predicated region body
PF: predicated region fallthrough
CT: control target
= control target key end

     0   :  { %s3098_s0 = inlined_call_operand.vmem [shape: f32[2,8], index: 0, kind: input, shape index: {}]   ;;  %s3099_s1 = inlined_call_operand.vmem [shape: f32[2,16,128], index: 1, kind: input, shape index: {}]   ;;  %s3100_s2 = inlined_call_operand.hbm [shape: f32[2,16,32], index: 2, kind: input, shape index: {}]   ;;  %s3101_s3 = inlined_call_operand.hbm [shape: f32[2,16,128], index: 3, kind: input, shape index: {}]   ;;  %s3102_s4 = inlined_call_operand.hbm [shape: f32[2,16,128], index: 4, kind: input, shape index: {}]   ;;  %s3103_s5 = inlined_call_operand.hbm [shape: f32[2,16,128], index: 5, kind: input, shape index: {}]   ;;  %s3104_s6 = inlined_call_operand.hbm [shape: f32[160,128], index: 6, kind: input, shape index: {}]   ;;  %s3105_s7 = inlined_call_operand.vmem [shape: f32[1,128], index: 7, kind: input, shape index: {}]   ;;  %s3106_s8 = inlined_call_operand.vmem [shape: f32[32,4], index: 8, kind: input, shape index: {}]   ;;  %s3107_s9 = inlined_call_operand.hbm [shape: f32[2,16,128], index: 9, kind: output, shape index: {0}]   ;;  %s3108_s10 = inlined_call_operand.hbm [shape: f32[2,16,128], index: 10, kind: output, shape index: {1}]   ;;  %s3109_s11 = inlined_call_operand.hbm [shape: f32[2,16,128], index: 11, kind: output, shape index: {2}]   ;;  %s3110_s12 = inlined_call_operand.hbm [shape: f32[2,16,128], index: 12, kind: output, shape index: {3}]   ;;  %s3111_s13 = inlined_call_operand.hbm [shape: f32[2,16,16], index: 13, kind: output, shape index: {4}]   ;;  %s3112_s14 = inlined_call_operand.hbm [shape: f32[2,1,4], index: 14, kind: output, shape index: {5}]  }
   0x1   :  { %3142 = sst [smem:[#allocation36_spill]] %s3098_s0 }
   0x2   :  { %3143 = sst [smem:[#allocation37_spill]] %s3099_s1 }
   0x3   :  { %3144 = sst [smem:[#allocation38_spill]] %s3100_s2 }
   0x4   :  { %3145 = sst [smem:[#allocation39_spill]] %s3101_s3 }
   0x5   :  { %3146 = sst [smem:[#allocation40_spill]] %s3102_s4 }
   0x6   :  { %3147 = sst [smem:[#allocation41_spill]] %s3103_s5 }
   0x7   :  { %3148 = sst [smem:[#allocation42_spill]] %s3104_s6 }
   0x8   :  { %3149 = sst [smem:[#allocation43_spill]] %s3105_s7 }
   0x9   :  { %3150 = sst [smem:[#allocation44_spill]] %s3107_s9 }
   0xa   :  { %3151 = sst [smem:[#allocation45_spill]] %s3108_s10 }
   0xb   :  { %3152 = sst [smem:[#allocation46_spill]] %s3109_s11 }
   0xc   :  { %3153 = sst [smem:[#allocation47_spill]] %s3110_s12 }
   0xd   :  { %3154 = sst [smem:[#allocation48_spill]] %s3111_s13 }
   0xe   :  { %3155 = sst [smem:[#allocation49_spill]] %s3112_s14 }
   0xf   :  { %20 = vsyncpa [#allocation5], 0 }
  0x10   :  { %21 = vsyncpa [#allocation3], 0 }
  0x11   :  { %23 = vsyncpa [#allocation3 + $0x1], 0 }
  0x12   :  { %24 = vsyncpa [#allocation8], 0 }
  0x13   :  { %26 = vsyncpa [#allocation8 + $0x1], 0 }
  0x14   :  { %27 = vsyncpa [#allocation11], 0 }
  0x15   :  { %29 = vsyncpa [#allocation11 + $0x1], 0 }
  0x16   :  { %30 = vsyncpa [#allocation4], 0 }
  0x17   :  { %32 = vsyncpa [#allocation4 + $0x1], 0 }
  0x18   :  { %33 = vsyncpa [#allocation15], 0 }
  0x19   :  { %35 = vsyncpa [#allocation15 + $0x1], 0 }
  0x1a   :  { %36 = vsyncpa [#allocation18], 0 }
  0x1b   :  { %38 = vsyncpa [#allocation18 + $0x1], 0 }
  0x1c   :  { %39 = vsyncpa [#allocation21], 0 }
  0x1d   :  { %41 = vsyncpa [#allocation21 + $0x1], 0  ;;  %s2417_s29 = smov 0   ;;  %s2419_s30 = smov 0  }
  0x1e   :  { %s2421_s15 = smov 0   ;;  %s2423_s16 = smov 0  }
  0x1f LB: > { %3156 = sst [smem:[#allocation31_spill]] %s2309_s29  ;;  %s2438_s17 = sadd.s32 4294967295, %s2321_s16   ;;  %s2321_s16 = sphi %s2423_s16, %s3209_s16   ;;  %s2317_s15 = sphi %s2421_s15, %s3213_s15   ;;  %s2313_s30 = sphi %s2419_s30, %s3212_s30   ;;  %s2309_s29 = sphi %s2417_s29, %s3211_s29  }
  0x20   : > { %s3113_s18 = sadd.s32 4294967294, %s2321_s16   ;;  %s2442_s19 = sadd.s32 1, %s2321_s16  }
  0x21   : > { %3157 = sst [smem:[#allocation32_spill]] %s2442_s19  ;;  %s101_s20 = sadd.s32 1, %s2317_s15 }
  0x22   : > { %s98_s21 = ssub.s32 %s2321_s16, %s2442_s19  ;;  %p108_p0 = scmp.ne.s32.totalorder %s2317_s15, %s2313_s30 }
  0x23   : > { %p99_p1 = scmp.eq.s32.totalorder %s98_s21, 0  ;;  %p109_p2 = scmp.eq.s32.totalorder %s2321_s16, 0 }
  0x24   : > { %p114_p3 = scmp.ne.s32.totalorder %s2313_s30, %s2309_s29  ;;  %p3122_p4 = scmp.eq.s32.totalorder %s2438_s17, 0 }
  0x25   : > { %s2454_s22 = scalar_select %p99_p1, %s2317_s15, %s101_s20  }
  0x26   : > { %p2456_p5 = por %p109_p2, %p108_p0  ;;  %p2462_p6 = por %p3122_p4, %p114_p3 }
  0x27   : > { %3158 = sst [smem:[#allocation33_spill]] %s2454_s22  ;;  %p279_p7 = scmp.eq.s32.totalorder %s2438_s17, 1 }
  0x28   : > { %s3159_s23 = scalar_select %p2456_p5, 1, 0 }
  0x29   : > { %s3160_s24 = scalar_select %p2462_p6, 1, 0 }
  0x2a   : > { %p285_p8 = scmp.eq.s32.totalorder %s3113_s18, 1  ;;  %p1578_p9 = scmp.ge.s32.totalorder %s2321_s16, 1 }
  0x2b   : > { %p422_p10 = scmp.lt.s32.totalorder %s2321_s16, 3  ;;  %p2471_p11 = por %p279_p7, %p108_p0 }
  0x2c   : > { %p2475_p12 = por %p285_p8, %p114_p3  ;;  %s2323_s28 = smov [#allocation12]  }
  0x2d   : > { %s3161_s25 = scalar_select %p2471_p11, 1, 0 }
  0x2e   : > { %s3163_s26 = scalar_select %p2475_p12, 1, 0 }
  0x2f   : > { %3162 = sst [smem:[#allocation34_spill]] %s3161_s25  ;;  %p2479_p13 = pnand %p1578_p9, %p422_p10 }
  0x30   : > { %3164 = sst [smem:[#allocation35_spill]] %s3163_s26  ;;  %s445_s20 = sshll.u32 %s2323_s28, 4  ;;  %s446_s20 = int_to_ptr.vmem [resolvable:$true] %s445_s20 }
  0x31   : > { %s3165_s27 = scalar_select %p2479_p13, 1, 0 }
  0x32   : > { %p1826_p1 = pneg %p2479_p13  ;;  %s3121_s18 = sand.u32 1, %s2317_s15  }
  0x33   : > { %s2496_s22 = sshll.u32 %s3121_s18, 4  ;;  %s3167_s6 = sld [smem:[#allocation42_spill]] }
  0x34   : > { %p2487_p2 = pnand %p1826_p1, %p3122_p4 }
  0x36   : > { %s3166_s21 = scalar_select %p2487_p2, 1, 0 }
  0x37   : > { %p3133_p8 = pneg %p2487_p2 }
  0x39   : > { %s1924_s29 = scalar_lea.hbm %s3167_s6, 2560 }
  0x3a   : > { %p1925_p7 = scmp.ne.s32.totalorder %s3167_s6, %s1924_s29  ;;  %p1931_p1 = scmp.lt.u32.totalorder %s1924_s29, %s3167_s6 }
  0x3c   : > { %p1927_p9 = pnand %p3133_p8, %p1925_p7 }
  0x3e   : > { %p1928_p10 = pneg %p1927_p9 }
  0x40   : > { %p1933_p0 = pnand %p1931_p1, %p1928_p10 }
  0x42   : > { %1936 = shalt.err (!%p1933_p0)
}
  0x43   : > { %s1937_s18 = scalar_lea.vmem %s446_s20, 2560  ;;  %p1945_p11 = scmp.lt.s32.totalorder %s446_s20, %s446_s20 }
  0x44   : > { %p1938_p4 = scmp.ne.s32.totalorder %s446_s20, %s1937_s18  ;;  %p1946_p6 = scmp.lt.s32.totalorder %s1937_s18, %s1937_s18 }
  0x46   : > { %p1940_p3 = pnand %p1938_p4, %p3133_p8  ;;  %p1947_p13 = por %p1946_p6, %p1945_p11 }
  0x48   : > { %p1941_p12 = pneg %p1940_p3 }
  0x4a   : > { %p1948_p5 = pnand %p1947_p13, %p1941_p12 }
  0x4c   : > { %1951 = shalt.err (!%p1948_p5)
}
  0x4d   : > { %s3128_s13 = smov 128   ;;  %s3130_s11 = smov 8  }
  0x4e   : > { %1832 = dma.hbm_to_vmem [thread:$0]  (!%p2487_p2), %s3167_s6, 2560, %s446_s20, [#allocation11], %s3128_s13, %s3128_s13, %s3130_s11  }
  0x4f   : > { %s2524_s18 = sshll.u32 %s2321_s16, 8  ;;  %p3168_p4 = scmp.ne.s32.totalorder %s3159_s23, 0 }
  0x50   : > { %p3169_p5 = scmp.lt.s32.totalorder %s2321_s16, 2  ;;  %s3132_s26 = sand.u32 1, %s2321_s16  }
  0x51   : > { %s3171_s3 = sld [smem:[#allocation39_spill]]  ;;  %s498_s20 = scalar_lea.vmem [#allocation7], %s2496_s22 }
  0x52   : > { %p2530_p6 = pnand %p3169_p5, %p3168_p4  ;;  %s505_s14 = sshll.u32 %s498_s20, 4  ;;  %s2542_s14 = int_to_ptr.vmem [resolvable:$true] %s505_s14 }
  0x53   : > { %s2546_s23 = scalar_lea.sflag [#allocation8], %s3132_s26 }
  0x54   : > { %p2552_p12 = pneg %p2530_p6 }
  0x57   : > { %s2539_s12 = scalar_lea.hbm %s3171_s3, %s2524_s18  ;;  %s1957_s20 = scalar_lea.hbm %s3171_s3, 512 }
  0x58   : > { %s1952_s29 = scalar_lea.hbm %s2539_s12, 256  ;;  %p1958_p3 = scmp.lt.u32.totalorder %s2539_s12, %s3171_s3 }
  0x59   : > { %p1953_p11 = scmp.ne.s32.totalorder %s2539_s12, %s1952_s29  ;;  %p1959_p7 = scmp.lt.u32.totalorder %s1957_s20, %s1952_s29 }
  0x5a   : > { %p1961_p10 = scmp.lt.u32.totalorder %s1952_s29, %s2539_s12 }
  0x5b   : > { %p1955_p13 = pnand %p2552_p12, %p1953_p11  ;;  %p1960_p9 = por %p1959_p7, %p1958_p3 }
  0x5d   : > { %p1956_p0 = pneg %p1955_p13  ;;  %p1962_p1 = por %p1961_p10, %p1960_p9 }
  0x5f   : > { %p1963_p4 = pnand %p1962_p1, %p1956_p0 }
  0x61   : > { %1966 = shalt.err (!%p1963_p4)
}
  0x62   : > { %s1967_s26 = scalar_lea.vmem %s2542_s14, 256  ;;  %s2326_s9 = smov [#allocation7]  }
  0x63   : > { %p1968_p5 = scmp.ne.s32.totalorder %s2542_s14, %s1967_s26  ;;  %s1972_s28 = sshll.u32 %s2326_s9, 4  ;;  %s1973_s28 = int_to_ptr.vmem [resolvable:$false] %s1972_s28 }
  0x64   : > { %s1974_s6 = scalar_lea.vmem %s1973_s28, 512  ;;  %p1975_p8 = scmp.lt.s32.totalorder %s2542_s14, %s1973_s28 }
  0x65   : > { %p1970_p11 = pnand %p1968_p5, %p2552_p12  ;;  %p1976_p2 = scmp.lt.s32.totalorder %s1974_s6, %s1967_s26 }
  0x67   : > { %p1971_p13 = pneg %p1970_p11  ;;  %p1977_p3 = por %p1976_p2, %p1975_p8 }
  0x69   : > { %p1978_p7 = pnand %p1977_p3, %p1971_p13 }
  0x6b   : > { %1981 = shalt.err (!%p1978_p7)
}
  0x6c   : > { %s3173_s11 = smov 8   ;;  %s3174_s29 = smov 128  }
  0x6d   : > { %1839 = dma.hbm_to_vmem [thread:$0]  (!%p2530_p6), %s2539_s12, 256, %s2542_s14, %s2546_s23, %s3174_s29, %s3174_s29, %s3173_s11  }
  0x6e   : > { %s3175_s0 = sld [smem:[#allocation36_spill]]  ;;  %p3176_p2 = scmp.ne.s32.totalorder %s3166_s21, 0 }
  0x70   : > { %p3177_p8 = pneg %p3176_p2 }
  0x74   : > { %s435_s9 = sshll.u32 %s3175_s0, 4  ;;  %s436_s9 = int_to_ptr.vmem [resolvable:$true] %s435_s9 }
  0x75   : > { %s1982_s28 = scalar_lea.vmem %s436_s9, 32  ;;  %p1990_p1 = scmp.lt.s32.totalorder %s436_s9, %s436_s9 }
  0x76   : > { %p1983_p0 = scmp.ne.s32.totalorder %s436_s9, %s1982_s28  ;;  %p1991_p4 = scmp.lt.s32.totalorder %s1982_s28, %s1982_s28 }
  0x78   : > { %p1985_p9 = pnand %p1983_p0, %p3177_p8  ;;  %p1992_p5 = por %p1991_p4, %p1990_p1 }
  0x7a   : > { %p1986_p10 = pneg %p1985_p9 }
  0x7c   : > { %p1993_p11 = pnand %p1992_p5, %p1986_p10 }
  0x7e   : > { %1996 = shalt.err (!%p1993_p11)
}
  0x7f   : > { %s2327_s26 = smov [#allocation2]   ;;  %s3178_s2 = sld [smem:[#allocation38_spill]] }
  0x80   : > { %1829 = dma.vmem_to_smem (!%p3176_p2), %s436_s9, 32, %s2327_s26, [#allocation5]  }
  0x81   : > { %s477_s6 = scalar_lea.vmem [#allocation6], %s2496_s22  ;;  %s3179_s4 = sld [smem:[#allocation40_spill]] }
  0x82   : > { %s484_s20 = sshll.u32 %s477_s6, 4  ;;  %s3180_s10 = sand.u32 1, %s2317_s15   ;;  %s2594_s20 = int_to_ptr.vmem [resolvable:$true] %s484_s20 }
  0x83   : > { %s2604_s9 = scalar_lea.sflag [#allocation3], %s3180_s10 }
  0x85   : > { %s2591_s14 = scalar_lea.hbm %s3178_s2, %s2524_s18  ;;  %s2002_s25 = scalar_lea.hbm %s3178_s2, 512 }
  0x86   : > { %s1997_s26 = scalar_lea.hbm %s2591_s14, 256  ;;  %p2003_p0 = scmp.lt.u32.totalorder %s2591_s14, %s3178_s2 }
  0x87   : > { %s2600_s0 = scalar_lea.hbm %s3179_s4, %s2524_s18  ;;  %p1998_p13 = scmp.ne.s32.totalorder %s2591_s14, %s1997_s26 }
  0x88   : > { %p2004_p2 = scmp.lt.u32.totalorder %s2002_s25, %s1997_s26  ;;  %p2006_p9 = scmp.lt.u32.totalorder %s1997_s26, %s2591_s14 }
  0x89   : > { %p2000_p3 = pnand %p1998_p13, %p2552_p12 }
  0x8a   : > { %p2005_p8 = por %p2004_p2, %p2003_p0 }
  0x8b   : > { %p2001_p7 = pneg %p2000_p3 }
  0x8c   : > { %p2007_p10 = por %p2006_p9, %p2005_p8 }
  0x8e   : > { %p2008_p1 = pnand %p2007_p10, %p2001_p7 }
  0x90   : > { %2011 = shalt.err (!%p2008_p1)
}
  0x91   : > { %s2012_s10 = scalar_lea.vmem %s2594_s20, 256  ;;  %s2328_s21 = smov [#allocation6]  }
  0x92   : > { %p2013_p4 = scmp.ne.s32.totalorder %s2594_s20, %s2012_s10  ;;  %s2017_s28 = sshll.u32 %s2328_s21, 4  ;;  %s2018_s28 = int_to_ptr.vmem [resolvable:$false] %s2017_s28 }
  0x93   : > { %s2019_s7 = scalar_lea.vmem %s2018_s28, 512  ;;  %p2020_p13 = scmp.lt.s32.totalorder %s2594_s20, %s2018_s28 }
  0x94   : > { %p2015_p5 = pnand %p2013_p4, %p2552_p12  ;;  %p2021_p3 = scmp.lt.s32.totalorder %s2019_s7, %s2012_s10 }
  0x96   : > { %p2016_p11 = pneg %p2015_p5  ;;  %p2022_p0 = por %p2021_p3, %p2020_p13 }
  0x98   : > { %p2023_p2 = pnand %p2022_p0, %p2016_p11 }
  0x9a   : > { %2026 = shalt.err (!%p2023_p2)
}
  0x9b   : > { %1836 = dma.hbm_to_vmem [thread:$0]  (!%p2530_p6), %s2591_s14, 256, %s2594_s20, %s2604_s9, %s3174_s29, %s3174_s29, %s3173_s11  }
  0x9c   : > { %s519_s25 = scalar_lea.vmem [#allocation9], %s2496_s22  ;;  %s3181_s5 = sld [smem:[#allocation41_spill]] }
  0x9d   : > { %s526_s26 = sshll.u32 %s519_s25, 4  ;;  %s2027_s10 = scalar_lea.hbm %s2600_s0, 256  ;;  %s2632_s26 = int_to_ptr.vmem [resolvable:$true] %s526_s26 }
  0x9e   : > { %p2028_p7 = scmp.ne.s32.totalorder %s2600_s0, %s2027_s10  ;;  %s2032_s7 = scalar_lea.hbm %s3179_s4, 512 }
  0x9f   : > { %p2033_p10 = scmp.lt.u32.totalorder %s2600_s0, %s3179_s4  ;;  %p2034_p1 = scmp.lt.u32.totalorder %s2032_s7, %s2027_s10 }
  0xa0   : > { %p2030_p8 = pnand %p2028_p7, %p2552_p12  ;;  %p2036_p5 = scmp.lt.u32.totalorder %s2027_s10, %s2600_s0 }
  0xa1   : > { %p2035_p4 = por %p2034_p1, %p2033_p10 }
  0xa2   : > { %s2638_s6 = scalar_lea.hbm %s3181_s5, %s2524_s18  ;;  %p2031_p9 = pneg %p2030_p8 }
  0xa3   : > { %p2037_p11 = por %p2036_p5, %p2035_p4 }
  0xa5   : > { %p2038_p13 = pnand %p2037_p11, %p2031_p9 }
  0xa7   : > { %2041 = shalt.err (!%p2038_p13)
}
  0xa8   : > { %s2042_s18 = scalar_lea.vmem %s2632_s26, 256  ;;  %s2329_s20 = smov [#allocation9]  }
  0xa9   : > { %p2043_p3 = scmp.ne.s32.totalorder %s2632_s26, %s2042_s18  ;;  %s2047_s9 = sshll.u32 %s2329_s20, 4  ;;  %s2048_s9 = int_to_ptr.vmem [resolvable:$false] %s2047_s9 }
  0xaa   : > { %s2049_s2 = scalar_lea.vmem %s2048_s9, 512  ;;  %p2050_p7 = scmp.lt.s32.totalorder %s2632_s26, %s2048_s9 }
  0xab   : > { %p2045_p0 = pnand %p2043_p3, %p2552_p12  ;;  %p2051_p8 = scmp.lt.s32.totalorder %s2049_s2, %s2042_s18 }
  0xad   : > { %p2046_p2 = pneg %p2045_p0  ;;  %p2052_p10 = por %p2051_p8, %p2050_p7 }
  0xaf   : > { %p2053_p1 = pnand %p2052_p10, %p2046_p2 }
  0xb1   : > { %2056 = shalt.err (!%p2053_p1)
}
  0xb2   : > { %1842 = dma.hbm_to_vmem [thread:$0]  (!%p2530_p6), %s2600_s0, 256, %s2632_s26, %s2546_s23, %s3174_s29, %s3174_s29, %s3173_s11  }
  0xb3   : > { %s540_s25 = scalar_lea.vmem [#allocation10], %s2496_s22  ;;  %s3182_s12 = sand.u32 1, %s2321_s16  }
  0xb4   : > { %s547_s3 = sshll.u32 %s540_s25, 4  ;;  %s2670_s10 = scalar_lea.sflag [#allocation11], %s3182_s12  ;;  %s2666_s3 = int_to_ptr.vmem [resolvable:$true] %s547_s3 }
  0xb5   : > { %s2057_s21 = scalar_lea.hbm %s2638_s6, 256  ;;  %s2062_s14 = scalar_lea.hbm %s3181_s5, 512 }
  0xb6   : > { %p2058_p9 = scmp.ne.s32.totalorder %s2638_s6, %s2057_s21  ;;  %p2063_p11 = scmp.lt.u32.totalorder %s2638_s6, %s3181_s5 }
  0xb7   : > { %p2064_p13 = scmp.lt.u32.totalorder %s2062_s14, %s2057_s21  ;;  %p2066_p0 = scmp.lt.u32.totalorder %s2057_s21, %s2638_s6 }
  0xb8   : > { %p2060_p4 = pnand %p2058_p9, %p2552_p12 }
  0xb9   : > { %p2065_p3 = por %p2064_p13, %p2063_p11 }
  0xba   : > { %p2061_p5 = pneg %p2060_p4 }
  0xbb   : > { %p2067_p2 = por %p2066_p0, %p2065_p3 }
  0xbd   : > { %p2068_p7 = pnand %p2067_p2, %p2061_p5 }
  0xbf   : > { %2071 = shalt.err (!%p2068_p7)
}
  0xc0   : > { %s2072_s0 = scalar_lea.vmem %s2666_s3, 256  ;;  %s2330_s22 = smov [#allocation10]  }
  0xc1   : > { %p2073_p8 = scmp.ne.s32.totalorder %s2666_s3, %s2072_s0  ;;  %s2077_s23 = sshll.u32 %s2330_s22, 4  ;;  %s2078_s23 = int_to_ptr.vmem [resolvable:$false] %s2077_s23 }
  0xc2   : > { %s2079_s26 = scalar_lea.vmem %s2078_s23, 512  ;;  %p2080_p9 = scmp.lt.s32.totalorder %s2666_s3, %s2078_s23 }
  0xc3   : > { %p2075_p10 = pnand %p2073_p8, %p2552_p12  ;;  %p2081_p4 = scmp.lt.s32.totalorder %s2079_s26, %s2072_s0 }
  0xc5   : > { %p2076_p1 = pneg %p2075_p10  ;;  %p2082_p11 = por %p2081_p4, %p2080_p9 }
  0xc7   : > { %p2083_p13 = pnand %p2082_p11, %p2076_p1 }
  0xc9   : > { %2086 = shalt.err (!%p2083_p13)
}
  0xca   : > { %1845 = dma.hbm_to_vmem [thread:$0]  (!%p2530_p6), %s2638_s6, 256, %s2666_s3, %s2670_s10, %s3174_s29, %s3174_s29, %s3173_s11  }
  0xcb   : > { %p3183_p12 = scmp.ne.s32.totalorder %s3165_s27, 0 }
  0xcc   : > { %p3184_p5 = scmp.eq.s32.totalorder (!%p3183_p12), %s2438_s17, 0 }
  0xcd   : > { %559 = sbr.rel (%p3183_p12) target bundleno = 802 (0x322), region = 56 }
  0xd4   : > { %2272 = dma.done.wait (%p3184_p5), [#allocation5], 32   ;;  %p3185_p3 = pmov %p3184_p5 }
  0xd5   : > { %s2704_s13 = sand.u32 1, %s2313_s30   ;;  %p3186_p6 = scmp.ne.s32.totalorder %s3160_s24, 0 }
  0xd6   : > { %2274 = vsyncadd (%p3185_p3), [#allocation5], 4294967264  ;;  %s2707_s19 = sshll.u32 %s2704_s13, 4  ;;  %s566_s9 = scalar_lea.sflag [#allocation3], %s2704_s13 }
  0xd7   : > { %s569_s11 = scalar_lea.vmem [#allocation6], %s2707_s19 }
  0xd8   : > { %2276 = dma.done.wait (%p3186_p6), %s566_s9, 256  }
  0xd9   : > { %2278 = vsyncadd (%p3186_p6), %s566_s9, 4294967040  ;;  %s2716_s27 = sand.u32 1, %s2438_s17   ;;  %s578_s6 = scalar_lea.vmem [#allocation7], %s2707_s19 }
  0xda   : > { %s575_s29 = scalar_lea.sflag [#allocation8], %s2716_s27 }
  0xdb   : > { %2280 = dma.done.wait (%p3186_p6), %s575_s29, 512  }
  0xdc   : > { %2282 = vsyncadd (%p3186_p6), %s575_s29, 4294966784  ;;  %s587_s2 = scalar_lea.vmem [#allocation9], %s2707_s19  ;;  %s593_s25 = scalar_lea.sflag [#allocation11], %s2716_s27 }
  0xdd   : > { %s596_s3 = scalar_lea.vmem [#allocation10], %s2707_s19 }
  0xde   : > { %2284 = dma.done.wait (%p3186_p6), %s593_s25, 256  }
  0xdf   : > { %2286 = vsyncadd (%p3186_p6), %s593_s25, 4294967040  ;;  %p3187_p0 = pmov %p3185_p3 }
  0xe1   : > { %2288 = dma.done.wait (%p3187_p0), [#allocation11], 2560   ;;  %p3188_p2 = pmov %p3187_p0 }
  0xe3   : > { %2290 = vsyncadd (%p3188_p2), [#allocation11], 4294964736 }
  0xe4   : > { %605 = sfence }
  0xe5   : > { %v747_v0 = vld [vmem:[#allocation12 + $0x80] sm:$0xff]  ;;  %v748_v1 = vld [vmem:[#allocation12 + $0x88] sm:$0xff]  ;;  %v749_v5 = vld [vmem:[#allocation12 + $0x90] sm:$0xff]  ;;  %p690_p7 = scmp.lt.s32.totalorder %s2438_s17, 1  ;;  %s2737_s24 = sshll.u32 %s2438_s17, 7  ;;  %vm751_vm0 = vcmask 261120  }
  0xe6   : > { %v731_v2 = vld [vmem:[#allocation12] sm:$0xff]  ;;  %v1744_v3 = vpack.c.bf16 %v748_v1, %v747_v0  ;;  %v732_v4 = vld [vmem:[#allocation12 + $0x8] sm:$0xff]  ;;  %v750_v6 = vld [vmem:[#allocation12 + $0x98] sm:$0xff]  ;;  %s2740_s12 = sld [smem:[#allocation2 + %s2737_s24]]  ;;  %s702_s10 = sadd.s32 1, %s2737_s24  ;;  %vm2332_vm2 = vmmov 0  }
  0xe7   : > { %v1752_v7 = vpack.c.bf16 %v732_v4, %v731_v2  ;;  %v1748_v8 = vpack.c.bf16 %v750_v6, %v749_v5  ;;  %v733_v9 = vld [vmem:[#allocation12 + $0x10] sm:$0xff]  ;;  %v734_v10 = vld [vmem:[#allocation12 + $0x18] sm:$0xff]  ;;  %v735_v12 = vld [vmem:[#allocation12 + $0x20] sm:$0xff]  ;;  %s691_s21 = scalar_select %p690_p7, %s2438_s17, 1  ;;  %v2331_v2 = vmov 0.0|0.0   ;;  %v2333_v5 = vmov 0.0  }
  0xe8   : > { %1745 = vmatprep.subr.bf16.mxu1 %v1744_v3  ;;  %v1756_v11 = vpack.c.bf16 %v734_v10, %v733_v9  ;;  %v736_v13 = vld [vmem:[#allocation12 + $0x28] sm:$0xff]  ;;  %v729_v14 = vld [vmem:[%s569_s11] sm:$0xff]  ;;  %s2753_s28 = sld [smem:[#allocation2 + %s702_s10]]  ;;  %s713_s7 = sadd.s32 2, %s2737_s24  ;;  %vm2766_vm1 = vmpackc.low %vm751_vm0, %vm751_vm0  ;;  %vm1002_vm3 = vcmask 130048   ;;  %vm1115_vm4 = vcmask 24576  }
  0xe9   : > { %1753 = vmatprep.subr.bf16.mxu0 %v1752_v7  ;;  %1747 = vmatpush3.bf16.msra.mxu1 %v1744_v3  ;;  %v1027_v15 = vsel %vm751_vm0, %v729_v14, 0.0  ;;  %v2751_v16 = vld [vmem:[%s569_s11 + $0x8] sm:$0xff]  ;;  %s1641_s14 = sshll.u32 %s691_s21, 4  ;;  %s2759_s18 = sld [smem:[#allocation2 + %s713_s7]]  ;;  %v1760_v19 = vpack.c.bf16 %v736_v13, %v735_v12  ;;  %v737_v22 = vld [vmem:[#allocation12 + $0x30] sm:$0xff]  ;;  %v739_v32 = vld [vmem:[#allocation12 + $0x40] sm:$0xff] }
  0xea   : > { %1755 = vmatpush3.bf16.msra.mxu0 %v1752_v7  ;;  %1749 = vmatprep.subr.bf16.mxu1 %v1748_v8  ;;  %v1028_v17 = vsel %vm751_vm0, %v2751_v16, 0.0  ;;  %v1784_v18 = vpack.c.bf16 %v2751_v16, %v729_v14  ;;  %s3191_s1 = sld [smem:[#allocation37_spill]]  ;;  %s718_s23 = sadd.s32 3, %s2737_s24  ;;  %v738_v23 = vld [vmem:[#allocation12 + $0x38] sm:$0xff]  ;;  %v704_v26 = vld [vmem:[%s578_s6] sm:$0xff]  ;;  %v740_v34 = vld [vmem:[#allocation12 + $0x48] sm:$0xff] }
  0xeb   : > { %1757 = vmatprep.subr.bf16.mxu0 %v1756_v11  ;;  %1688 = vmatprep.mubr.msk.f32.mxu1 %vm751_vm0, %v729_v14  ;;  %v2762_v20 = vadd.f32 %v1028_v17, %v1027_v15  ;;  %s2774_s26 = sld [smem:[#allocation2 + %s718_s23]]  ;;  %v705_v30 = vld [vmem:[%s578_s6 + $0x8] sm:$0xff]  ;;  %v1764_v31 = vpack.c.bf16 %v738_v23, %v737_v22  ;;  %v720_v37 = vld [vmem:[%s587_s2] sm:$0xff]  ;;  %v1768_v45 = vpack.c.bf16 %v740_v34, %v739_v32  ;;  %s2798_s9 = scalar_lea.vmem [#allocation14], %s2707_s19 }
  0xec   : > { %v699_v25 = vstv %s2740_s12  ;;  %v721_v39 = vld [vmem:[%s587_s2 + $0x8] sm:$0xff]  ;;  %v741_v48 = vld [vmem:[#allocation12 + $0x50] sm:$0xff]  ;;  %s2808_s11 = scalar_lea.vmem [#allocation16], %s2707_s19  ;;  %v743_v53 = vld [vmem:[#allocation12 + $0x60] sm:$0xff]  ;;  %s1122_s20 = sadd.s32 5, %s2737_s24 }
  0xed   : > { %1751 = vmatpush3.bf16.msra.mxu1 %v1748_v8  ;;  %v742_v49 = vld [vmem:[#allocation12 + $0x58] sm:$0xff]  ;;  %v744_v54 = vld [vmem:[#allocation12 + $0x68] sm:$0xff]  ;;  %v745_v56 = vld [vmem:[#allocation12 + $0x70] sm:$0xff]  ;;  %v1030_v59 = vrot.slane %v2762_v20, 4  ;;  %s1117_s0 = sadd.s32 4, %s2737_s24  ;;  %s1123_s23 = sld [smem:[#allocation2 + %s1122_s20]] }
  0xee   : > { %1759 = vmatpush3.bf16.msra.mxu0 %v1756_v11  ;;  %1786 = vmatprep.subr.msk.bf16.mxu1 %vm2766_vm1, %v1784_v18  ;;  %v706_v33 = vstv %s2753_s28  ;;  %v1772_v52 = vpack.c.bf16 %v742_v49, %v741_v48  ;;  %v1776_v55 = vpack.c.bf16 %v744_v54, %v743_v53  ;;  %v746_v57 = vld [vmem:[#allocation12 + $0x78] sm:$0xff]  ;;  %v1038_v63 = vld [vmem:[%s3106_s8] sm:$0xff]  ;;  %v1039_v0 = vld [vmem:[%s3106_s8 + $0x8] sm:$0xff]  ;;  %s2850_s6 = scalar_lea.vmem [#allocation17], %s2707_s19  ;;  %s2863_s2 = sshll.u32 %s2438_s17, 8 }
  0xef   : > { %1761 = vmatprep.subr.bf16.mxu0 %v1760_v19  ;;  %v707_v35 = vmul.f32 %v706_v33, %v704_v26  ;;  %v715_v36 = vstv %s2759_s18  ;;  %v708_v38 = vmul.f32 %v706_v33, %v705_v30  ;;  %v1780_v58 = vpack.c.bf16 %v746_v57, %v745_v56  ;;  %v1040_v1 = vld [vmem:[%s3106_s8 + $0x10] sm:$0xff]  ;;  %v1041_v4 = vld [vmem:[%s3106_s8 + $0x18] sm:$0xff]  ;;  %s3192_s18 = sld [smem:[#allocation43_spill]]  ;;  %s3139_s25 = scalar_lea.vmem [#allocation20], %s2704_s13 }
  0xf0   : > { %s694_s22 = scalar_lea.vmem %s3191_s1, %s1641_s14  ;;  %1689 = vmatmul.mubr.msk.f32.vlgmr.msra.gmra.mrb[0].mxu1 %vm751_vm0, %v2751_v16  ;;  %v1031_v60 = vadd.f32 %v1030_v59, %v2762_v20  ;;  %v1791_v3 = vpack.c.bf16 %v1039_v0, %v1038_v63  ;;  %v1794_v7 = vpack.c.bf16 %v1041_v4, %v1040_v1  ;;  %v1131_v33 = vld [vmem:[%s596_s3] sm:$0xff]  ;;  %s3194_s21 = sld [smem:[#allocation45_spill]] }
  0xf1   : > { %v695_v24 = vld [vmem:[%s694_s22] sm:$0xff]  ;;  %v696_v27 = vld [vmem:[%s694_s22 + $0x8] sm:$0xff]  ;;  %1730 = vmatprep.mubr.msk.f32.mxu1 %vm751_vm0, %v729_v14  ;;  %v722_v43 = vstv %s2774_s26  ;;  %s1129_s22 = sadd.s32 6, %s2737_s24  ;;  %s1118_s26 = sld [smem:[#allocation2 + %s1117_s0]] }
  0xf2   : > { %v700_v28 = vmul.f32 %v699_v25, %v695_v24  ;;  %v701_v29 = vmul.f32 %v699_v25, %v696_v27  ;;  %v716_v40 = vmul.f32 %v715_v36, %v695_v24  ;;  %v717_v41 = vmul.f32 %v715_v36, %v696_v27  ;;  %1763 = vmatpush3.bf16.msra.mxu0 %v1760_v19  ;;  %s1130_s29 = sld [smem:[#allocation2 + %s1129_s22]]  ;;  %s2845_s24 = scalar_lea.vmem [#allocation13], %s2707_s19 }
  0xf3   : > { %1765 = vmatprep.subr.bf16.mxu0 %v1764_v31  ;;  %v723_v46 = vmul.f32 %v722_v43, %v720_v37  ;;  %v724_v47 = vmul.f32 %v722_v43, %v721_v39  ;;  %v1032_v61 = vrot.slane %v1031_v60, 2  ;;  %v1124_v25 = vstv %s1123_s23  ;;  %s1194_s7 = sshll.u32 %s2798_s9, 4  ;;  %s3195_s20 = sld [smem:[#allocation47_spill]]  ;;  %s2875_s7 = int_to_ptr.vmem [resolvable:$true] %s1194_s7 }
  0xf4   : > { %v2792_v42 = vadd.f32 %v707_v35, %v700_v28  ;;  %v2795_v44 = vadd.f32 %v708_v38, %v701_v29  ;;  %v1132_v28 = vld [vmem:[%s596_s3 + $0x8] sm:$0xff]  ;;  %s3193_s3 = sld [smem:[#allocation34_spill]]  ;;  %s3140_s22 = scalar_lea.sflag [#allocation15], %s2716_s27 }
  0xf5   : > { %v725_v50 = vadd.f32 %v723_v46, %v716_v40  ;;  %v726_v51 = vadd.f32 %v724_v47, %v717_v41  ;;  %v1033_v62 = vadd.f32 %v1032_v61, %v1031_v60  ;;  %v1611_v19 = vld [vmem:[%s3192_s18] ss:$0 sm:$0xff]  ;;  %s2087_s23 = scalar_lea.vmem %s2875_s7, 256 }
  0xf6   : > { %711 = vst [vmem:[%s2798_s9] sm:$0xff] %v2792_v42  ;;  %1723 = vmatprep.mubr.f32.mxu0 %v2792_v42  ;;  %712 = vst [vmem:[%s2798_s9 + $0x8] sm:$0xff] %v2795_v44  ;;  %1767 = vmatpush3.bf16.msra.mxu0 %v1764_v31  ;;  %v1126_v31 = vmul.f32 %v1124_v25, %v2795_v44  ;;  %v1125_v34 = vmul.f32 %v1124_v25, %v2792_v42  ;;  %s2872_s28 = scalar_lea.hbm %s3194_s21, %s2863_s2  ;;  %p2088_p8 = scmp.ne.s32.totalorder %s2875_s7, %s2087_s23 }
  0xf7   : > { %1789 = vmatpush3.bf16.xpose.msk.msra.mxu1 %vm2766_vm1, %v1784_v18  ;;  %1769 = vmatprep.subr.bf16.mxu0 %v1768_v45  ;;  %727 = vst [vmem:[%s2808_s11] sm:$0xff] %v725_v50  ;;  %728 = vst [vmem:[%s2808_s11 + $0x8] sm:$0xff] %v726_v51  ;;  %v1034_v6 = vrot.slane %v1033_v62, 1  ;;  %v1119_v27 = vstv %s1118_s26  ;;  %s2334_s26 = smov [#allocation14]  }
  0xf8   : > { %1790 = vmatprep.subr.bf16.mxu1 %v2331_v2  ;;  %v1133_v29 = vstv %s1130_s29  ;;  %s2091_s29 = sshll.u32 %s2334_s26, 4  ;;  %s2092_s29 = int_to_ptr.vmem [resolvable:$false] %s2091_s29 }
  0xf9   : > { %v1035_v8 = vadd.f32 %v1034_v6, %v1033_v62  ;;  %v1135_v37 = vmul.f32 %v1133_v29, %v1132_v28  ;;  %v1134_v39 = vmul.f32 %v1133_v29, %v1131_v33  ;;  %s2881_s0 = scalar_lea.hbm %s3195_s20, %s2863_s2  ;;  %s2093_s9 = scalar_lea.vmem %s2092_s29, 512 }
  0xfa   : > { %1771 = vmatpush3.bf16.msra.mxu0 %v1768_v45  ;;  %p3196_p10 = scmp.ne.s32.totalorder %s3193_s3, 0  ;;  %p2094_p4 = scmp.lt.s32.totalorder %s2875_s7, %s2092_s29 }
  0xfb   : > { %1773 = vmatprep.subr.bf16.mxu0 %v1772_v52  ;;  %v1037_v9 = vmul.f32 0.0625, %v1035_v8  ;;  %p2095_p11 = scmp.lt.s32.totalorder %s2093_s9, %s2087_s23 }
  0xfc   : > { %p2089_p1 = pnand %p2088_p8, %p3196_p10 }
  0xfd   : > { %p2096_p13 = por %p2095_p11, %p2094_p4 }
  0xfe   : > { %1731 = vmatmul.mubr.msk.f32.vlgmr.msra.gmra.mrb[2].mxu1 %vm751_vm0, %v2751_v16  ;;  %1775 = vmatpush3.bf16.msra.mxu0 %v1772_v52  ;;  %p2090_p9 = pneg %p2089_p1 }
  0xff   : > { %1777 = vmatprep.subr.bf16.mxu0 %v1776_v55  ;;  %1741 = vmatprep.mubr.msk.f32.mxu1 %vm2332_vm2, %v2333_v5 }
 0x100   : > { %1792 = vmatpush3.bf16.msra.mxu1 %v1791_v3  ;;  %p2097_p12 = pnand %p2096_p13, %p2090_p9 }
 0x101   : > { %1793 = vmatprep.subr.bf16.mxu1 %v2331_v2 }
 0x102   : > { %1779 = vmatpush3.bf16.msra.mxu0 %v1776_v55 }
 0x103   : > { %1781 = vmatprep.subr.bf16.mxu0 %v1780_v58 }
 0x104   : > { %1795 = vmatpush3.bf16.msra.mxu1 %v1794_v7 }
 0x106   : > { %1783 = vmatpush3.bf16.msra.mxu0 %v1780_v58 }
 0x107   : > { %1742 = vmatmul.mubr.msk.f32.vlgmr.msra.gmra.mrb[4].mxu1 %vm751_vm0, %v1037_v9 }
 0x109   : > { %1724 = vmatmul.mubr.f32.vlgmr.msra.gmra.mrb[0].mxu0 %v2795_v44 }
 0x1c3   : > { %v1690_v10 = vpop.f32.mrb[0].mxu1 }
 0x1c4   : > { %v824_v11 = vpop.f32.mrb[1].mxu1 }
 0x1d1   : > { %v1732_v12 = vpop.f32.mrb[2].mxu1 }
 0x1d2   : > { %v991_v13 = vpop.f32.mrb[3].mxu1  ;;  %v1001_v15 = vmul.f32 0.17677669, %v1732_v12 }
 0x1d3   : > { %v1000_v14 = vmul.f32 0.17677669, %v991_v13 }
 0x1d4   : > { %v1006_v17 = vsel %vm1002_vm3, %v1001_v15, -inf }
 0x1d5   : > { %v1003_v16 = vsel %vm1002_vm3, %v1000_v14, -inf }
 0x1d6   : > { %1004 = vmax.xlane.f32.xlu0 %v1003_v16 }
 0x1da   : > { %1007 = vmax.xlane.f32.xlu0 %v1006_v17  ;;  %v1111_v54 = vpop.f32.mrb[4].mxu1 }
 0x1db   : > { %v1743_v55 = vpop.f32.mrb[5].mxu1  ;;  %1116 = vst.msk [vmem:[%s3139_s25] sm:$0x1] %vm1115_vm4, %v1111_v54 }
 0x1dc   : > { %v1725_v18 = vpop.f32.mrb[0].mxu0 }
 0x1dd   : > { %v905_v20 = vadd.f32 %v1725_v18, %v1690_v10  ;;  %v899_v21 = vpop.f32.mrb[1].mxu0 }
 0x1de   : > { %v900_v22 = vadd.f32 %v899_v21, %v824_v11 }
 0x1df   : > { %v916_v23 = vadd.f32 %v1611_v19, %v905_v20 }
 0x1e0   : > { %v915_v24 = vadd.f32 %v1611_v19, %v900_v22 }
 0x1e1   : > { %1912 = vtanh.f32 %v916_v23 }
 0x1e2   : > { %1914 = vtanh.f32 %v915_v24 }
 0x1eb   : > { %v1913_v26 = vpop.eup %1912 }
 0x1ec   : > { %v1915_v30 = vpop.eup %1914  ;;  %v1613_v32 = vclamps-f32 %v1913_v26, 1.0 }
 0x1ed   : > { %v1612_v35 = vclamps-f32 %v1915_v30, 1.0 }
 0x1ee   : > { %924 = vst [vmem:[%s2845_s24 + $0x8] sm:$0xff] %v1613_v32  ;;  %v1121_v36 = vmul.f32 %v1613_v32, %v1119_v27 }
 0x1ef   : > { %923 = vst [vmem:[%s2845_s24] sm:$0xff] %v1612_v35  ;;  %v1120_v38 = vmul.f32 %v1612_v35, %v1119_v27 }
 0x1f0   : > { %v1128_v40 = vadd.f32 %v1126_v31, %v1121_v36 }
 0x1f1   : > { %v1127_v41 = vadd.f32 %v1125_v34, %v1120_v38 }
 0x1f2   : > { %v1137_v43 = vadd.f32 %v1135_v37, %v1128_v40 }
 0x1f3   : > { %v1136_v44 = vadd.f32 %v1134_v39, %v1127_v41 }
 0x1f4   : > { %1139 = vst [vmem:[%s2850_s6 + $0x8] sm:$0xff] %v1137_v43 }
 0x1f5   : > { %1138 = vst [vmem:[%s2850_s6] sm:$0xff] %v1136_v44 }
 0x263   : > { %v1005_v42 = vpop.xlane.xlu0 %1004 }
 0x264   : > { %v1009_v45 = vsub.f32 %v1000_v14, %v1005_v42 }
 0x266   : > { %v1011_v46 = vmul.f32 1.442695, %v1009_v45 }
 0x267   : > { %v1008_v47 = vpop.xlane.xlu0 %1007 }
 0x268   : > { %1916 = vpow2.f32 %v1011_v46  ;;  %v1010_v48 = vsub.f32 %v1001_v15, %v1008_v47 }
 0x26a   : > { %v1013_v49 = vmul.f32 1.442695, %v1010_v48 }
 0x26c   : > { %1918 = vpow2.f32 %v1013_v49 }
 0x272   : > { %v2854_v50 = vpop.eup %1916 }
 0x273   : > { %v1015_v51 = vsel %vm1002_vm3, %v2854_v50, 0.0 }
 0x274   : > { %1016 = vadd.xlane.f32.xlu1 %v1015_v51 }
 0x276   : > { %v2858_v52 = vpop.eup %1918 }
 0x277   : > { %v1018_v53 = vsel %vm1002_vm3, %v2858_v52, 0.0 }
 0x278   : > { %1019 = vadd.xlane.f32.xlu1 %v1018_v53 }
 0x279   : > { %2100 = shalt.err (!%p2097_p12)
}
 0x27a   : > { %s2101_s12 = scalar_lea.hbm %s2872_s28, 256  ;;  %s2105_s18 = scalar_lea.hbm %s3194_s21, 512 }
 0x27b   : > { %p2102_p5 = scmp.ne.s32.totalorder %s2872_s28, %s2101_s12  ;;  %p2106_p0 = scmp.lt.u32.totalorder %s2872_s28, %s3194_s21 }
 0x27c   : > { %p2107_p2 = scmp.lt.u32.totalorder %s2105_s18, %s2101_s12  ;;  %p2109_p8 = scmp.lt.u32.totalorder %s2101_s12, %s2872_s28 }
 0x27d   : > { %p2103_p3 = pnand %p2102_p5, %p3196_p10 }
 0x27e   : > { %p2108_p7 = por %p2107_p2, %p2106_p0 }
 0x27f   : > { %p2104_p6 = pneg %p2103_p3 }
 0x280   : > { %p2110_p1 = por %p2109_p8, %p2108_p7 }
 0x282   : > { %p2111_p9 = pnand %p2110_p1, %p2104_p6 }
 0x284   : > { %2114 = shalt.err (!%p2111_p9)
}
 0x285   : > { %s2335_s23 = smov 128   ;;  %s2336_s9 = smov 8  }
 0x286   : > { %1815 = dma.vmem_to_hbm [thread:$0]  (%p3196_p10), %s2875_s7, 256, %s2872_s28, %s3140_s22, %s2335_s23, %s2335_s23, %s2336_s9  }
 0x287   : > { %s1226_s12 = sshll.u32 %s2850_s6, 4  ;;  %s3197_s18 = sld [smem:[#allocation44_spill]]  ;;  %s2911_s12 = int_to_ptr.vmem [resolvable:$true] %s1226_s12 }
 0x288   : > { %s3141_s29 = scalar_lea.sflag [#allocation18], %s2716_s27  ;;  %s2115_s25 = scalar_lea.vmem %s2911_s12, 256 }
 0x289   : > { %p2116_p4 = scmp.ne.s32.totalorder %s2911_s12, %s2115_s25  ;;  %s2337_s1 = smov [#allocation17]  }
 0x28a   : > { %s2119_s4 = sshll.u32 %s2337_s1, 4  ;;  %s2120_s4 = int_to_ptr.vmem [resolvable:$false] %s2119_s4 }
 0x28b   : > { %p2117_p11 = pnand %p2116_p4, %p3196_p10  ;;  %s2121_s6 = scalar_lea.vmem %s2120_s4, 512 }
 0x28c   : > { %p2122_p12 = scmp.lt.s32.totalorder %s2911_s12, %s2120_s4  ;;  %p2123_p5 = scmp.lt.s32.totalorder %s2121_s6, %s2115_s25 }
 0x28d   : > { %s2917_s26 = scalar_lea.hbm %s3197_s18, %s2863_s2  ;;  %p2118_p13 = pneg %p2117_p11 }
 0x28e   : > { %p2124_p3 = por %p2123_p5, %p2122_p12 }
 0x290   : > { %p2125_p6 = pnand %p2124_p3, %p2118_p13 }
 0x292   : > { %2128 = shalt.err (!%p2125_p6)
}
 0x293   : > { %s2129_s28 = scalar_lea.hbm %s2881_s0, 256  ;;  %s2133_s1 = scalar_lea.hbm %s3195_s20, 512 }
 0x294   : > { %p2130_p0 = scmp.ne.s32.totalorder %s2881_s0, %s2129_s28  ;;  %p2134_p8 = scmp.lt.u32.totalorder %s2881_s0, %s3195_s20 }
 0x295   : > { %p2135_p1 = scmp.lt.u32.totalorder %s2133_s1, %s2129_s28  ;;  %p2137_p4 = scmp.lt.u32.totalorder %s2129_s28, %s2881_s0 }
 0x296   : > { %p2131_p2 = pnand %p2130_p0, %p3196_p10 }
 0x297   : > { %p2136_p9 = por %p2135_p1, %p2134_p8 }
 0x298   : > { %p2132_p7 = pneg %p2131_p2 }
 0x299   : > { %p2138_p11 = por %p2137_p4, %p2136_p9 }
 0x29b   : > { %p2139_p13 = pnand %p2138_p11, %p2132_p7 }
 0x29d   : > { %2142 = shalt.err (!%p2139_p13)
}
 0x29e   : > { %1817 = dma.vmem_to_hbm [thread:$0]  (%p3196_p10), %s2911_s12, 256, %s2881_s0, %s3141_s29, %s2335_s23, %s2335_s23, %s2336_s9  }
 0x29f   : > { %s1178_s25 = sshll.u32 %s2845_s24, 4  ;;  %s3198_s7 = sld [smem:[#allocation46_spill]]  ;;  %s2953_s25 = int_to_ptr.vmem [resolvable:$true] %s1178_s25 }
 0x2a0   : > { %s1210_s1 = sshll.u32 %s2808_s11, 4  ;;  %s1141_s14 = scalar_lea.sflag [#allocation4], %s2704_s13  ;;  %s2985_s1 = int_to_ptr.vmem [resolvable:$true] %s1210_s1 }
 0x2a1   : > { %s2143_s4 = scalar_lea.vmem %s2953_s25, 256  ;;  %s2338_s22 = smov [#allocation13]  }
 0x2a2   : > { %p2144_p12 = scmp.ne.s32.totalorder %s2953_s25, %s2143_s4  ;;  %s2147_s0 = sshll.u32 %s2338_s22, 4  ;;  %s2148_s0 = int_to_ptr.vmem [resolvable:$false] %s2147_s0 }
 0x2a3   : > { %s2149_s24 = scalar_lea.vmem %s2148_s0, 512  ;;  %p2150_p6 = scmp.lt.s32.totalorder %s2953_s25, %s2148_s0 }
 0x2a4   : > { %p2145_p5 = pnand %p2144_p12, %p3196_p10  ;;  %p2151_p0 = scmp.lt.s32.totalorder %s2149_s24, %s2143_s4 }
 0x2a5   : > { %s2951_s10 = scalar_lea.hbm %s3198_s7, %s2863_s2 }
 0x2a6   : > { %p2146_p3 = pneg %p2145_p5  ;;  %p2152_p2 = por %p2151_p0, %p2150_p6 }
 0x2a8   : > { %p2153_p7 = pnand %p2152_p2, %p2146_p3 }
 0x2aa   : > { %2156 = shalt.err (!%p2153_p7)
}
 0x2ab   : > { %s2157_s12 = scalar_lea.hbm %s2917_s26, 256  ;;  %s2161_s22 = scalar_lea.hbm %s3197_s18, 512 }
 0x2ac   : > { %p2158_p8 = scmp.ne.s32.totalorder %s2917_s26, %s2157_s12  ;;  %p2162_p4 = scmp.lt.u32.totalorder %s2917_s26, %s3197_s18 }
 0x2ad   : > { %p2163_p11 = scmp.lt.u32.totalorder %s2161_s22, %s2157_s12  ;;  %p2165_p12 = scmp.lt.u32.totalorder %s2157_s12, %s2917_s26 }
 0x2ae   : > { %p2159_p1 = pnand %p2158_p8, %p3196_p10 }
 0x2af   : > { %p2164_p13 = por %p2163_p11, %p2162_p4 }
 0x2b0   : > { %p2160_p9 = pneg %p2159_p1 }
 0x2b1   : > { %p2166_p5 = por %p2165_p12, %p2164_p13 }
 0x2b3   : > { %p2167_p3 = pnand %p2166_p5, %p2160_p9 }
 0x2b5   : > { %2170 = shalt.err (!%p2167_p3)
}
 0x2b6   : > { %1814 = dma.vmem_to_hbm [thread:$0]  (%p3196_p10), %s2953_s25, 256, %s2917_s26, %s1141_s14, %s2335_s23, %s2335_s23, %s2336_s9  }
 0x2b7   : > { %s2171_s29 = scalar_lea.vmem %s2985_s1, 256  ;;  %s2339_s4 = smov [#allocation16]  }
 0x2b8   : > { %p2172_p6 = scmp.ne.s32.totalorder %s2985_s1, %s2171_s29  ;;  %s2175_s24 = sshll.u32 %s2339_s4, 4  ;;  %s2176_s24 = int_to_ptr.vmem [resolvable:$false] %s2175_s24 }
 0x2b9   : > { %s2177_s12 = scalar_lea.vmem %s2176_s24, 512  ;;  %p2178_p7 = scmp.lt.s32.totalorder %s2985_s1, %s2176_s24 }
 0x2ba   : > { %p2173_p0 = pnand %p2172_p6, %p3196_p10  ;;  %p2179_p8 = scmp.lt.s32.totalorder %s2177_s12, %s2171_s29 }
 0x2bc   : > { %p2174_p2 = pneg %p2173_p0  ;;  %p2180_p1 = por %p2179_p8, %p2178_p7 }
 0x2be   : > { %p2181_p9 = pnand %p2180_p1, %p2174_p2 }
 0x2c0   : > { %2184 = shalt.err (!%p2181_p9)
}
 0x2c1   : > { %s2185_s11 = scalar_lea.hbm %s2951_s10, 256  ;;  %s2189_s14 = scalar_lea.hbm %s3198_s7, 512 }
 0x2c2   : > { %p2186_p4 = scmp.ne.s32.totalorder %s2951_s10, %s2185_s11  ;;  %p2190_p12 = scmp.lt.u32.totalorder %s2951_s10, %s3198_s7 }
 0x2c3   : > { %p2191_p5 = scmp.lt.u32.totalorder %s2189_s14, %s2185_s11  ;;  %p2193_p6 = scmp.lt.u32.totalorder %s2185_s11, %s2951_s10 }
 0x2c4   : > { %p2187_p11 = pnand %p2186_p4, %p3196_p10 }
 0x2c5   : > { %p2192_p3 = por %p2191_p5, %p2190_p12 }
 0x2c6   : > { %p2188_p13 = pneg %p2187_p11 }
 0x2c7   : > { %p2194_p0 = por %p2193_p6, %p2192_p3 }
 0x2c9   : > { %p2195_p2 = pnand %p2194_p0, %p2188_p13 }
 0x2cb   : > { %2198 = shalt.err (!%p2195_p2)
}
 0x2cc   : > { %s3199_s22 = scalar_lea.sflag [#allocation15], %s2716_s27  ;;  %s1634_s0 = sshll.u32 %s2438_s17, 4 }
 0x2cd   : > { %1816 = dma.vmem_to_hbm [thread:$0]  (%p3196_p10), %s2985_s1, 256, %s2951_s10, %s3199_s22, %s2335_s23, %s2335_s23, %s2336_s9  }
 0x2ce   : > { %s3200_s24 = sld [smem:[#allocation49_spill]]  ;;  %s3201_s11 = scalar_lea.vmem [#allocation20], %s2704_s13 }
 0x2cf   : > { %s1258_s26 = sshll.u32 %s3201_s11, 4  ;;  %s1166_s25 = scalar_lea.sflag [#allocation21], %s2704_s13  ;;  %s1259_s26 = int_to_ptr.vmem [resolvable:$true] %s1258_s26 }
 0x2d0   : > { %s2199_s14 = scalar_lea.vmem %s1259_s26, 16  ;;  %s2340_s6 = smov [#allocation20]  }
 0x2d1   : > { %p2200_p7 = scmp.ne.s32.totalorder %s1259_s26, %s2199_s14  ;;  %s2203_s28 = sshll.u32 %s2340_s6, 4  ;;  %s2204_s28 = int_to_ptr.vmem [resolvable:$false] %s2203_s28 }
 0x2d2   : > { %s2205_s5 = scalar_lea.vmem %s2204_s28, 32  ;;  %p2206_p9 = scmp.lt.s32.totalorder %s1259_s26, %s2204_s28 }
 0x2d3   : > { %p2201_p8 = pnand %p2200_p7, %p3196_p10  ;;  %p2207_p4 = scmp.lt.s32.totalorder %s2205_s5, %s2199_s14 }
 0x2d4   : > { %s3017_s12 = scalar_lea.hbm %s3200_s24, %s1634_s0 }
 0x2d5   : > { %p2202_p1 = pneg %p2201_p8  ;;  %p2208_p11 = por %p2207_p4, %p2206_p9 }
 0x2d7   : > { %p2209_p13 = pnand %p2208_p11, %p2202_p1 }
 0x2d9   : > { %2212 = shalt.err (!%p2209_p13)
}
 0x2da   : > { %s2213_s17 = scalar_lea.hbm %s3017_s12, 16  ;;  %s2217_s1 = scalar_lea.hbm %s3200_s24, 32 }
 0x2db   : > { %p2214_p12 = scmp.ne.s32.totalorder %s3017_s12, %s2213_s17  ;;  %p2218_p6 = scmp.lt.u32.totalorder %s3017_s12, %s3200_s24 }
 0x2dc   : > { %p2219_p0 = scmp.lt.u32.totalorder %s2217_s1, %s2213_s17  ;;  %p2221_p7 = scmp.lt.u32.totalorder %s2213_s17, %s3017_s12 }
 0x2dd   : > { %p2215_p5 = pnand %p2214_p12, %p3196_p10 }
 0x2de   : > { %p2220_p2 = por %p2219_p0, %p2218_p6 }
 0x2df   : > { %p2216_p3 = pneg %p2215_p5 }
 0x2e0   : > { %p2222_p8 = por %p2221_p7, %p2220_p2 }
 0x2e2   : > { %p2223_p1 = pnand %p2222_p8, %p2216_p3 }
 0x2e4   : > { %2226 = shalt.err (!%p2223_p1)
}
 0x2e5   : > { %1819 = dma.vmem_to_hbm [thread:$0]  (%p3196_p10), %s1259_s26, 16, %s3017_s12, %s1166_s25  }
 0x2e6   : > { %s683_s5 = scalar_lea.vmem [#allocation19], %s2707_s19  ;;  %s3202_s14 = sld [smem:[#allocation48_spill]] }
 0x2e7   : > { %s1242_s29 = sshll.u32 %s683_s5, 4  ;;  %s2341_s19 = smov [#allocation19]   ;;  %s3049_s29 = int_to_ptr.vmem [resolvable:$true] %s1242_s29 }
 0x2e8   : > { %s2227_s12 = scalar_lea.vmem %s3049_s29, 256  ;;  %s2231_s26 = sshll.u32 %s2341_s19, 4  ;;  %s2232_s26 = int_to_ptr.vmem [resolvable:$false] %s2231_s26 }
 0x2e9   : > { %p2228_p9 = scmp.ne.s32.totalorder %s3049_s29, %s2227_s12  ;;  %s2233_s25 = scalar_lea.vmem %s2232_s26, 512 }
 0x2ea   : > { %p2234_p13 = scmp.lt.s32.totalorder %s3049_s29, %s2232_s26  ;;  %p2235_p12 = scmp.lt.s32.totalorder %s2233_s25, %s2227_s12 }
 0x2eb   : > { %p2229_p4 = pnand %p2228_p9, %p3196_p10 }
 0x2ec   : > { %s3047_s6 = scalar_lea.hbm %s3202_s14, %s2863_s2  ;;  %p2236_p5 = por %p2235_p12, %p2234_p13 }
 0x2ed   : > { %p2230_p11 = pneg %p2229_p4 }
 0x2ef   : > { %p2237_p3 = pnand %p2236_p5, %p2230_p11 }
 0x301   : > { %v1017_v56 = vpop.xlane.xlu1 %1016 }
 0x302   : > { %1920 = vrcp.f32 %v1017_v56 }
 0x305   : > { %v1020_v57 = vpop.xlane.xlu1 %1019 }
 0x306   : > { %1922 = vrcp.f32 %v1020_v57 }
 0x30c   : > { %v1921_v58 = vpop.eup %1920 }
 0x30d   : > { %v1023_v59 = vmul.f32 %v1921_v58, %v2854_v50 }
 0x30f   : > { %1025 = vst.msk [vmem:[%s683_s5] sm:$0xff] %vm1002_vm3, %v1023_v59 }
 0x310   : > { %v1923_v60 = vpop.eup %1922 }
 0x311   : > { %v1024_v61 = vmul.f32 %v1923_v60, %v2858_v52 }
 0x313   : > { %1026 = vst.msk [vmem:[%s683_s5 + $0x8] sm:$0xff] %vm1002_vm3, %v1024_v61 }
 0x314   : > { %2240 = shalt.err (!%p2237_p3)
}
 0x315   : > { %s2241_s2 = scalar_lea.hbm %s3047_s6, 256  ;;  %s2245_s13 = scalar_lea.hbm %s3202_s14, 512 }
 0x316   : > { %p2242_p6 = scmp.ne.s32.totalorder %s3047_s6, %s2241_s2  ;;  %p2246_p7 = scmp.lt.u32.totalorder %s3047_s6, %s3202_s14 }
 0x317   : > { %p2247_p8 = scmp.lt.u32.totalorder %s2245_s13, %s2241_s2  ;;  %p2249_p9 = scmp.lt.u32.totalorder %s2241_s2, %s3047_s6 }
 0x318   : > { %p2243_p0 = pnand %p2242_p6, %p3196_p10 }
 0x319   : > { %p2248_p1 = por %p2247_p8, %p2246_p7 }
 0x31a   : > { %p2244_p2 = pneg %p2243_p0 }
 0x31b   : > { %p2250_p4 = por %p2249_p9, %p2248_p1 }
 0x31d   : > { %p2251_p11 = pnand %p2250_p4, %p2244_p2 }
 0x31f   : > { %2254 = shalt.err (!%p2251_p11)
}
 0x320   : > { %s3203_s22 = scalar_lea.sflag [#allocation18], %s2716_s27 }
 0x321   : > { %1818 = dma.vmem_to_hbm [thread:$0]  (%p3196_p10), %s3049_s29, 256, %s3047_s6, %s3203_s22, %s2335_s23, %s2335_s23, %s2336_s9  }
 0x322 PF: > { %s3204_s0 = sld [smem:[#allocation31_spill]]  ;;  %s3205_s5 = sld [smem:[#allocation35_spill]] }
 0x323   : > { %p3207_p12 = scmp.ge.s32.totalorder %s2321_s16, 2 }
 0x328   : > { %s1270_s4 = sand.u32 1, %s3204_s0   ;;  %p3206_p13 = scmp.ne.s32.totalorder %s3205_s5, 0 }
 0x329   : > { %s1271_s11 = scalar_lea.sflag [#allocation4], %s1270_s4 }
 0x32a   : > { %p1847_p5 = pnand %p3207_p12, %p3206_p13 }
 0x32c   : > { %2292 = dma.done.wait (!%p1847_p5), %s1271_s11, 256  }
 0x32d   : > { %2294 = vsyncadd (!%p1847_p5), %s1271_s11, 4294967040  ;;  %s3208_s3 = sadd.s32 4294967294, %s2321_s16  }
 0x32e   : > { %s1279_s12 = sand.u32 1, %s3208_s3  }
 0x32f   : > { %s1280_s19 = scalar_lea.sflag [#allocation15], %s1279_s12 }
 0x330   : > { %2296 = dma.done.wait (!%p1847_p5), %s1280_s19, 512  }
 0x331   : > { %2298 = vsyncadd (!%p1847_p5), %s1280_s19, 4294966784  ;;  %s1298_s27 = scalar_lea.sflag [#allocation18], %s1279_s12 }
 0x332   : > { %2300 = dma.done.wait (!%p1847_p5), %s1298_s27, 512  }
 0x333   : > { %2302 = vsyncadd (!%p1847_p5), %s1298_s27, 4294966784  ;;  %s1316_s23 = scalar_lea.sflag [#allocation21], %s1270_s4 }
 0x334   : > { %2304 = dma.done.wait (!%p1847_p5), %s1316_s23, 16  }
 0x335   : > { %2306 = vsyncadd (!%p1847_p5), %s1316_s23, 4294967280  ;;  %s3209_s16 = sld [smem:[#allocation32_spill]]  ;;  %s3210_s9 = sld [smem:[#allocation33_spill]] }
 0x336   : > { %s3211_s29 = smov %s2313_s30  ;;  %s3212_s30 = smov %s2317_s15 }
 0x33b   : > { %p44_p10 = scmp.ge.s32.totalorder %s3209_s16, 4   ;;  %s3213_s15 = smov %s3210_s9 }
 0x33d   :  { %46 = sbr.rel (!%p44_p10) target bundleno = 31 (0x1f), region = 231 }
 0x344   :  { %1320 = vsyncpa [#allocation3], 1 }
 0x345   :  { %1322 = vsyncpa [#allocation3 + $0x1], 1 }
 0x346   :  { %1323 = vsyncpa [#allocation8], 1 }
 0x347   :  { %1325 = vsyncpa [#allocation8 + $0x1], 1 }
 0x348   :  { %1326 = vsyncpa [#allocation11], 1 }
 0x349   :  { %1328 = vsyncpa [#allocation11 + $0x1], 1 }
 0x34a   :  { %1329 = vsyncpa [#allocation4], 1 }
 0x34b   :  { %1331 = vsyncpa [#allocation4 + $0x1], 1 }
 0x34c   :  { %1332 = vsyncpa [#allocation15], 1 }
 0x34d   :  { %1334 = vsyncpa [#allocation15 + $0x1], 1 }
 0x34e   :  { %1335 = vsyncpa [#allocation18], 1 }
 0x34f   :  { %1337 = vsyncpa [#allocation18 + $0x1], 1 }
 0x350   :  { %1338 = vsyncpa [#allocation21], 1 }
 0x351   :  { %1340 = vsyncpa [#allocation21 + $0x1], 1 }
 0x352   :  { %1341 = vsyncpa [#allocation5], 1 }
 0x353   :  { %1343 = vsyncpa [#allocation5 + $0x1], 1 }

</bundles_post_ra>
